<compile_context>
chip_gen: v7x
topology: tpu7x:2x2x1
jax: 0.10.0
libtpu: 0.0.40
codegen_flags: <defaults>
</compile_context>

<pallas_src>
import jax
import jax.numpy as jnp
from jax.experimental import pallas as pl
from jax.experimental.pallas import tpu as pltpu


def get_padding(kernel_size, dilation=1):
    return (kernel_size * dilation - dilation) // 2


def _round_up(v, m):
    return -(-v // m) * m


def _vmem_budget_bytes():
    """~70% of this generation's VMEM, clamped to a sane range."""
    try:
        cap = int(pltpu.get_tpu_info().vmem_capacity_bytes)
    except Exception:
        cap = 64 << 20                       # conservative (v7x-sized) fallback
    return max(32 << 20, min(int(0.70 * cap), 100 << 20))


def _estimate_vmem_bytes(C, K, S, T, Twin_r, isz):
    cs = _round_up(C, 8)
    kc = _round_up(K * C + 1, 128)
    w_b = 2 * (2 * S * cs * kc * isz)                 # 2 weight tensors, double-buffered
    in_b = 2 * cs * _round_up(Twin_r, 128) * isz      # manual window double buffer
    out_b = 2 * cs * _round_up(T, 128) * isz          # pipelined output blocks
    # live f32 intermediates (cur/acc/next) + one stacked bf16 matmul operand
    inter = 4 * cs * _round_up(Twin_r, 128) * 4 + (K * cs + 8) * _round_up(Twin_r, 128) * isz
    return w_b + in_b + out_b + inter


# --------------------------------------------------------------------------- #
# Fused ResBlock1 kernel
# --------------------------------------------------------------------------- #
def _make_resblock1_kernel(K, dilations, T, Twin, Twin_r, L,
                           compute_dtype, silu_dtype):
    S = len(dilations)
    p2 = (K - 1) // 2                                    # padding of the dilation-1 conv
    halos = [get_padding(K, d) + p2 for d in dilations]  # per-stage halo (each side)
    rem = [sum(halos[s:]) for s in range(S + 1)]         # halo still needed at stage s
    H = rem[0]

    def silu(v):
        v = v.astype(silu_dtype)
        return v * jax.nn.sigmoid(v)

    def kernel(x_hbm, w1_ref, w2_ref, o_ref, buf, sem):
        b = pl.program_id(0)
        l = pl.program_id(1)
        n_l = pl.num_programs(1)

        def window_copy(li, slot):
            start = pl.multiple_of(li * T, 128)          # lane-aligned window start
            return pltpu.make_async_copy(
                x_hbm.at[b, :, pl.ds(start, Twin_r)], buf.at[slot], sem.at[slot])

        # Prime the double buffer at the first time step of this batch row ...
        @pl.when(l == 0)
        def _():
            window_copy(l, 0).start()

        # ... and keep one window of prefetch in flight (overlaps this step's compute).
        @pl.when(l + 1 < n_l)
        def _():
            window_copy(l + 1, (l + 1) % 2).start()

        slot = l % 2
        window_copy(l, slot).wait()

        # Does this tile touch the zero-padded boundary?  Interior tiles skip
        # all masking work via lax.cond.
        touches = (l * T < H) | ((l + 1) * T + H > L)
        iota = jax.lax.broadcasted_iota(jnp.int32, (1, Twin_r), 1)   # hoisted once

        def maybe_mask(a, g0):
            w = a.shape[1]

            def do_mask(v):
                pos = g0 + iota[:, :w]
                return jnp.where((pos >= 0) & (pos < L), v, jnp.zeros_like(v))

            return jax.lax.cond(touches, do_mask, lambda v: v, a)

        # Haloed stage-0 input; column j <-> global position l*T - H + j.
        cur = buf[slot][:, :Twin].astype(jnp.float32)    # (C, T + 2H), f32 residual chain

        for s in range(S):
            d = dilations[s]
            w_mid = T + 2 * (rem[s + 1] + p2)            # conv1 output width
            w_out = T + 2 * rem[s + 1]                   # stage output width

            # SiLU once per element, then the whole dilated conv (all K taps +
            # bias) as ONE MXU matmul with contraction depth K*C + 1.
            xt = silu(cur).astype(compute_dtype)
            xs = jnp.concatenate(
                [xt[:, k * d:k * d + w_mid] for k in range(K)]
                + [jnp.ones((1, w_mid), compute_dtype)], axis=0)     # bias row
            acc1 = jnp.dot(w1_ref[s], xs, preferred_element_type=jnp.float32)

            # PyTorch zero-pads conv2's input silu(y1): zero out-of-range columns
            # (only on boundary tiles).
            z = maybe_mask(silu(acc1).astype(compute_dtype),
                           l * T - (rem[s + 1] + p2))
            zs = jnp.concatenate(
                [z[:, k:k + w_out] for k in range(K)]
                + [jnp.ones((1, w_out), compute_dtype)], axis=0)
            acc2 = jnp.dot(w2_ref[s], zs, preferred_element_type=jnp.float32)

            # Residual add against the center of the stage input (f32 chain).
            h_s = rem[s] - rem[s + 1]
            nxt = acc2 + cur[:, h_s:h_s + w_out]
            if s < S - 1:
                # Next stage needs exact zeros outside [0, L) (PyTorch padding).
                nxt = maybe_mask(nxt, l * T - rem[s + 1])
            cur = nxt

        o_ref[0] = cur.astype(o_ref.dtype)               # lane-dense (C, T) store

    return kernel


def resblock1_forward(x, params, *, kernel_size=3, dilation=(1, 3, 5),
                      time_tile=None, compute_dtype=jnp.bfloat16,
                      silu_dtype=None):
    """Fused ResBlock1 forward (PyTorch semantics).

    x      : (B, C, L) float array.
    params : list of len(dilation) tuples (w1 (C,C,K), b1 (C,), w2 (C,C,K), b2 (C,))
             in torch Conv1d layout (w1 = dilated conv, w2 = dilation-1 conv).
    """
    B, C, L = x.shape
    K = kernel_size
    S = len(dilation)
    assert len(params) == S
    if silu_dtype is None:
        silu_dtype = compute_dtype      # pass jnp.float32 on v5e (no bf16 VPU/EUP)
    p2 = (K - 1) // 2
    H = sum(get_padding(K, d) + p2 for d in dilation)    # total halo per side
    isz = jnp.dtype(compute_dtype).itemsize

    # ---- tile size: generation-aware VMEM budget, never tiny tiles -----------
    budget = _vmem_budget_bytes()
    if time_tile is None:
        t_cap = 512 if budget <= (48 << 20) else 1024    # 64 MiB parts vs 128 MiB parts
        time_tile = min(t_cap, _round_up(L, 128))
    T = max(128, _round_up(time_tile, 128))
    T = max(T, min(512, _round_up(L, 128)))              # enforce T>=512 unless L is tiny
    while T > 256:                                        # shrink if estimate overshoots
        Twin_r = _round_up(T + 2 * H, 128)
        if _estimate_vmem_bytes(C, K, S, T, Twin_r, isz) <= budget:
            break
        T -= 128
    Twin = T + 2 * H
    Twin_r = _round_up(Twin, 128)
    nT = pl.cdiv(L, T)

    # ---- operands -------------------------------------------------------------
    # Stacked weights (S, Cout, K*Cin + 1): lane dim = contraction dim; bias in
    # the last column (paired with a constant-1 row of the activation operand).
    def stack_w(w, bias):
        w_r = jnp.transpose(w, (0, 2, 1)).reshape(C, K * C)
        return jnp.concatenate([w_r, bias.reshape(C, 1)], axis=1).astype(compute_dtype)

    w1_all = jnp.stack([stack_w(p[0], p[1]) for p in params])   # (S, C, K*C+1)
    w2_all = jnp.stack([stack_w(p[2], p[3]) for p in params])

    # Once-padded input (left pad H, right pad so every rounded window is in
    # bounds).  It stays in HBM; haloed windows are DMA'd in-kernel.
    Ltot = (nT - 1) * T + Twin_r
    x_pad = jnp.pad(x.astype(compute_dtype), ((0, 0), (0, 0), (H, Ltot - H - L)))

    kernel = _make_resblock1_kernel(K, tuple(dilation), T, Twin, Twin_r, L,
                                    compute_dtype, silu_dtype)
    KC1 = K * C + 1

    out = pl.pallas_call(
        kernel,
        out_shape=jax.ShapeDtypeStruct((B, C, L), compute_dtype),
        grid=(B, nT),
        in_specs=[
            pl.BlockSpec(memory_space=pl.ANY),                    # haloed src, manual DMA
            pl.BlockSpec((S, C, KC1), lambda b, l: (0, 0, 0)),    # VMEM-resident weights
            pl.BlockSpec((S, C, KC1), lambda b, l: (0, 0, 0)),
        ],
        out_specs=pl.BlockSpec((1, C, T), lambda b, l: (b, 0, l)),
        scratch_shapes=[
            pltpu.VMEM((2, C, Twin_r), compute_dtype),            # window double buffer
            pltpu.SemaphoreType.DMA((2,)),
        ],
        compiler_params=pltpu.CompilerParams(
            # batch may be split across cores; the time axis carries the manual
            # double-buffer state and must run sequentially in order.
            dimension_semantics=("parallel", "arbitrary"),
            vmem_limit_bytes=int(budget),
        ),
    )(x_pad, w1_all, w2_all)

    return out


# --------------------------------------------------------------------------- #
# Pure-JAX reference (f32) and test
# --------------------------------------------------------------------------- #
def _conv1d_ref(x, w, b, dilation):
    p = get_padding(w.shape[-1], dilation)
    y = jax.lax.conv_general_dilated(
        x, w, window_strides=(1,), padding=[(p, p)],
        rhs_dilation=(dilation,), dimension_numbers=("NCH", "OIH", "NCH"))
    return y + b[None, :, None]


def resblock1_reference(x, params, dilation):
    for (w1, b1, w2, b2), d in zip(params, dilation):
        xt = jax.nn.silu(x)
        xt = _conv1d_ref(xt, w1, b1, d)
        xt = jax.nn.silu(xt)
        xt = _conv1d_ref(xt, w2, b2, 1)
        x = xt + x
    return x


def _make_params(key, C, K, S):
    params = []
    for _ in range(S):
        key, k1, k2, k3, k4 = jax.random.split(key, 5)
        params.append((
            0.01 * jax.random.normal(k1, (C, C, K), jnp.float32),
            0.01 * jax.random.normal(k2, (C,), jnp.float32),
            0.01 * jax.random.normal(k3, (C, C, K), jnp.float32),
            0.01 * jax.random.normal(k4, (C,), jnp.float32),
        ))
    return params, key


if __name__ == "__main__":
    key = jax.random.PRNGKey(0)
    B, C, L = 2, 32, 300                  # small; L deliberately not a multiple of 128
    key, kx = jax.random.split(key)
    x = jax.random.normal(kx, (B, C, L), jnp.float32)

    for K, dil in [(3, (1, 3, 5)), (7, (1, 3, 5))]:
        params, key = _make_params(key, C, K, len(dil))
        out = resblock1_forward(x, params, kernel_size=K, dilation=dil)
        out = jax.block_until_ready(out)
        assert out.shape == (B, C, L), out.shape
        out32 = out.astype(jnp.float32)
        assert bool(jnp.all(jnp.isfinite(out32)))
        ref = resblock1_reference(x, params, dil)
        err = float(jnp.max(jnp.abs(out32 - ref)))
        assert err < 5e-2, f"K={K}: max abs err {err}"   # bf16-storage tolerance

    print("KERNEL_OK")
</pallas_src>

<mosaic_0001>
module attributes {stable_mosaic.version = 11 : i64} {
  func.func @kernel(%arg0: i32, %arg1: i32, %arg2: memref<2x32x512xbf16, #tpu.memory_space<any>>, %arg3: memref<3x32x97xbf16, #tpu.memory_space<vmem>>, %arg4: memref<3x32x97xbf16, #tpu.memory_space<vmem>>, %arg5: memref<1x32x384xbf16, #tpu.memory_space<vmem>>, %arg6: memref<2x32x512xbf16, #tpu.memory_space<vmem>>, %arg7: memref<2x!tpu.dma_semaphore, #tpu.memory_space<semaphore_mem>>) attributes {dimension_semantics = [#tpu.dimension_semantics<parallel>, #tpu.dimension_semantics<arbitrary>], iteration_bounds = array<i64: 2, 1>, scalar_prefetch = 0 : i64, scratch_operands = 2 : i64, tpu.core_type = #tpu.core_type<tc>, window_params = [{}, {pipeline_mode = #tpu.pipeline_mode<synchronous>, transform_indices = @transform_1, window_bounds = array<i64: 3, 32, 97>}, {pipeline_mode = #tpu.pipeline_mode<synchronous>, transform_indices = @transform_2, window_bounds = array<i64: 3, 32, 97>}, {transform_indices = @transform_3, window_bounds = array<i64: 1, 32, 384>}]} {
    %c0_i32 = arith.constant 0 : i32
    %0 = arith.cmpi eq, %arg1, %c0_i32 : i32
    %1 = arith.extui %0 : i1 to i32
    %c0_i32_0 = arith.constant 0 : i32
    %2 = arith.cmpi ne, %1, %c0_i32_0 : i32
    scf.if %2 {
      %c384_i32_63 = arith.constant 384 : i32
      %163 = arith.muli %arg1, %c384_i32_63 : i32
      %164 = tpu.assume_multiple %163, 128 : i32
      %c0_i32_64 = arith.constant 0 : i32
      %c0_i32_65 = arith.constant 0 : i32
      %c0_i32_66 = arith.constant 0 : i32
      %165 = tpu.memref_slice %arg2[%arg0, %c0_i32_66, %164] : memref<2x32x512xbf16, #tpu.memory_space<any>> -> memref<1x32x512xbf16, #tpu.memory_space<any>>
      %166 = tpu.memref_squeeze %165 : memref<1x32x512xbf16, #tpu.memory_space<any>> -> memref<32x512xbf16, #tpu.memory_space<any>>
      %c0_i32_67 = arith.constant 0 : i32
      %c0_i32_68 = arith.constant 0 : i32
      %167 = tpu.memref_slice %arg6[%c0_i32_64, %c0_i32_67, %c0_i32_68] : memref<2x32x512xbf16, #tpu.memory_space<vmem>> -> memref<1x32x512xbf16, #tpu.memory_space<vmem>>
      %168 = tpu.memref_squeeze %167 : memref<1x32x512xbf16, #tpu.memory_space<vmem>> -> memref<32x512xbf16, #tpu.memory_space<vmem>>
      %169 = tpu.memref_slice %arg7[%c0_i32_65] : memref<2x!tpu.dma_semaphore, #tpu.memory_space<semaphore_mem>> -> memref<1x!tpu.dma_semaphore, #tpu.memory_space<semaphore_mem>>
      %170 = tpu.memref_squeeze %169 : memref<1x!tpu.dma_semaphore, #tpu.memory_space<semaphore_mem>> -> memref<!tpu.dma_semaphore, #tpu.memory_space<semaphore_mem>>
      tpu.enqueue_dma source(%166 : memref<32x512xbf16, #tpu.memory_space<any>>) target(%168 : memref<32x512xbf16, #tpu.memory_space<vmem>>) target_semaphore(%170 : memref<!tpu.dma_semaphore, #tpu.memory_space<semaphore_mem>>)
    } else {
    }
    %c1_i32 = arith.constant 1 : i32
    %3 = arith.addi %arg1, %c1_i32 : i32
    %c1_i32_1 = arith.constant 1 : i32
    %4 = arith.cmpi slt, %3, %c1_i32_1 : i32
    %5 = arith.extui %4 : i1 to i32
    %c0_i32_2 = arith.constant 0 : i32
    %6 = arith.cmpi ne, %5, %c0_i32_2 : i32
    scf.if %6 {
      %c1_i32_63 = arith.constant 1 : i32
      %163 = arith.addi %arg1, %c1_i32_63 : i32
      %c1_i32_64 = arith.constant 1 : i32
      %164 = arith.addi %arg1, %c1_i32_64 : i32
      %c2_i32_65 = arith.constant 2 : i32
      %c0_i32_66 = arith.constant 0 : i32
      %165 = arith.cmpi eq, %c2_i32_65, %c0_i32_66 : i32
      %c1_i32_67 = arith.constant 1 : i32
      %166 = arith.select %165, %c1_i32_67, %c2_i32_65 : i32
      %167 = arith.remsi %164, %166 : i32
      %c0_i32_68 = arith.constant 0 : i32
      %168 = arith.cmpi ne, %167, %c0_i32_68 : i32
      %c0_i32_69 = arith.constant 0 : i32
      %169 = arith.cmpi slt, %167, %c0_i32_69 : i32
      %c0_i32_70 = arith.constant 0 : i32
      %170 = arith.cmpi slt, %166, %c0_i32_70 : i32
      %171 = arith.xori %169, %170 : i1
      %172 = arith.andi %171, %168 : i1
      %173 = arith.addi %167, %166 : i32
      %174 = arith.select %172, %173, %167 : i32
      %c384_i32_71 = arith.constant 384 : i32
      %175 = arith.muli %163, %c384_i32_71 : i32
      %176 = tpu.assume_multiple %175, 128 : i32
      %c0_i32_72 = arith.constant 0 : i32
      %177 = tpu.memref_slice %arg2[%arg0, %c0_i32_72, %176] : memref<2x32x512xbf16, #tpu.memory_space<any>> -> memref<1x32x512xbf16, #tpu.memory_space<any>>
      %178 = tpu.memref_squeeze %177 : memref<1x32x512xbf16, #tpu.memory_space<any>> -> memref<32x512xbf16, #tpu.memory_space<any>>
      %c0_i32_73 = arith.constant 0 : i32
      %c0_i32_74 = arith.constant 0 : i32
      %179 = tpu.memref_slice %arg6[%174, %c0_i32_73, %c0_i32_74] : memref<2x32x512xbf16, #tpu.memory_space<vmem>> -> memref<1x32x512xbf16, #tpu.memory_space<vmem>>
      %180 = tpu.memref_squeeze %179 : memref<1x32x512xbf16, #tpu.memory_space<vmem>> -> memref<32x512xbf16, #tpu.memory_space<vmem>>
      %181 = tpu.memref_slice %arg7[%174] : memref<2x!tpu.dma_semaphore, #tpu.memory_space<semaphore_mem>> -> memref<1x!tpu.dma_semaphore, #tpu.memory_space<semaphore_mem>>
      %182 = tpu.memref_squeeze %181 : memref<1x!tpu.dma_semaphore, #tpu.memory_space<semaphore_mem>> -> memref<!tpu.dma_semaphore, #tpu.memory_space<semaphore_mem>>
      tpu.enqueue_dma source(%178 : memref<32x512xbf16, #tpu.memory_space<any>>) target(%180 : memref<32x512xbf16, #tpu.memory_space<vmem>>) target_semaphore(%182 : memref<!tpu.dma_semaphore, #tpu.memory_space<semaphore_mem>>)
    } else {
    }
    %c2_i32 = arith.constant 2 : i32
    %c0_i32_3 = arith.constant 0 : i32
    %7 = arith.cmpi eq, %c2_i32, %c0_i32_3 : i32
    %c1_i32_4 = arith.constant 1 : i32
    %8 = arith.select %7, %c1_i32_4, %c2_i32 : i32
    %9 = arith.remsi %arg1, %8 : i32
    %c0_i32_5 = arith.constant 0 : i32
    %10 = arith.cmpi ne, %9, %c0_i32_5 : i32
    %c0_i32_6 = arith.constant 0 : i32
    %11 = arith.cmpi slt, %9, %c0_i32_6 : i32
    %c0_i32_7 = arith.constant 0 : i32
    %12 = arith.cmpi slt, %8, %c0_i32_7 : i32
    %13 = arith.xori %11, %12 : i1
    %14 = arith.andi %13, %10 : i1
    %15 = arith.addi %9, %8 : i32
    %16 = arith.select %14, %15, %9 : i32
    %c384_i32 = arith.constant 384 : i32
    %17 = arith.muli %arg1, %c384_i32 : i32
    %18 = tpu.assume_multiple %17, 128 : i32
    %c0_i32_8 = arith.constant 0 : i32
    %19 = tpu.memref_slice %arg2[%arg0, %c0_i32_8, %18] : memref<2x32x512xbf16, #tpu.memory_space<any>> -> memref<1x32x512xbf16, #tpu.memory_space<any>>
    %20 = tpu.memref_squeeze %19 : memref<1x32x512xbf16, #tpu.memory_space<any>> -> memref<32x512xbf16, #tpu.memory_space<any>>
    %c0_i32_9 = arith.constant 0 : i32
    %c0_i32_10 = arith.constant 0 : i32
    %21 = tpu.memref_slice %arg6[%16, %c0_i32_9, %c0_i32_10] : memref<2x32x512xbf16, #tpu.memory_space<vmem>> -> memref<1x32x512xbf16, #tpu.memory_space<vmem>>
    %22 = tpu.memref_squeeze %21 : memref<1x32x512xbf16, #tpu.memory_space<vmem>> -> memref<32x512xbf16, #tpu.memory_space<vmem>>
    %23 = tpu.memref_slice %arg7[%16] : memref<2x!tpu.dma_semaphore, #tpu.memory_space<semaphore_mem>> -> memref<1x!tpu.dma_semaphore, #tpu.memory_space<semaphore_mem>>
    %24 = tpu.memref_squeeze %23 : memref<1x!tpu.dma_semaphore, #tpu.memory_space<semaphore_mem>> -> memref<!tpu.dma_semaphore, #tpu.memory_space<semaphore_mem>>
    tpu.wait_dma2 semaphore(%24 : memref<!tpu.dma_semaphore, #tpu.memory_space<semaphore_mem>>) src(%20 : memref<32x512xbf16, #tpu.memory_space<any>>) dst(%22 : memref<32x512xbf16, #tpu.memory_space<vmem>>)
    %c384_i32_11 = arith.constant 384 : i32
    %25 = arith.muli %arg1, %c384_i32_11 : i32
    %c12_i32 = arith.constant 12 : i32
    %26 = arith.cmpi slt, %25, %c12_i32 : i32
    %c1_i32_12 = arith.constant 1 : i32
    %27 = arith.addi %arg1, %c1_i32_12 : i32
    %c384_i32_13 = arith.constant 384 : i32
    %28 = arith.muli %27, %c384_i32_13 : i32
    %c12_i32_14 = arith.constant 12 : i32
    %29 = arith.addi %28, %c12_i32_14 : i32
    %c300_i32 = arith.constant 300 : i32
    %30 = arith.cmpi sgt, %29, %c300_i32 : i32
    %31 = arith.ori %26, %30 : i1
    %32 = tpu.iota {dimensions = array<i32: 1>} : vector<1x512xi32>
    %33 = arith.index_cast %16 : i32 to index
    %c0 = arith.constant 0 : index
    %c0_15 = arith.constant 0 : index
    %34 = vector.load %arg6[%33, %c0, %c0_15] : memref<2x32x512xbf16, #tpu.memory_space<vmem>>, vector<1x32x512xbf16>
    %35 = vector.shape_cast %34 : vector<1x32x512xbf16> to vector<32x512xbf16>
    %36 = vector.extract_strided_slice %35 {offsets = [0, 0], sizes = [32, 408], strides = [1, 1]} : vector<32x512xbf16> to vector<32x408xbf16>
    %37 = arith.extf %36 : vector<32x408xbf16> to vector<32x408xf32>
    %38 = arith.truncf %37 : vector<32x408xf32> to vector<32x408xbf16>
    %39 = arith.negf %38 : vector<32x408xbf16>
    %40 = math.exp %39 : vector<32x408xbf16>
    %cst = arith.constant 1.000000e+00 : bf16
    %41 = vector.broadcast %cst : bf16 to vector<32x408xbf16>
    %42 = arith.addf %41, %40 : vector<32x408xbf16>
    %43 = arith.divf %41, %42 : vector<32x408xbf16>
    %44 = arith.mulf %38, %43 : vector<32x408xbf16>
    %45 = vector.extract_strided_slice %44 {offsets = [0, 0], sizes = [32, 406], strides = [1, 1]} : vector<32x408xbf16> to vector<32x406xbf16>
    %46 = vector.extract_strided_slice %44 {offsets = [0, 1], sizes = [32, 406], strides = [1, 1]} : vector<32x408xbf16> to vector<32x406xbf16>
    %47 = vector.extract_strided_slice %44 {offsets = [0, 2], sizes = [32, 406], strides = [1, 1]} : vector<32x408xbf16> to vector<32x406xbf16>
    %cst_16 = arith.constant 1.000000e+00 : bf16
    %48 = vector.broadcast %cst_16 : bf16 to vector<1x406xbf16>
    %49 = tpu.concatenate %45, %46, %47, %48 in 0 : vector<32x406xbf16>, vector<32x406xbf16>, vector<32x406xbf16>, vector<1x406xbf16> -> vector<97x406xbf16>
    %c0_17 = arith.constant 0 : index
    %c0_18 = arith.constant 0 : index
    %c0_19 = arith.constant 0 : index
    %50 = vector.load %arg3[%c0_17, %c0_18, %c0_19] : memref<3x32x97xbf16, #tpu.memory_space<vmem>>, vector<1x32x97xbf16>
    %51 = vector.shape_cast %50 : vector<1x32x97xbf16> to vector<32x97xbf16>
    %cst_20 = arith.constant dense<0.000000e+00> : vector<32x406xf32>
    %52 = tpu.matmul %51, %49, %cst_20 {dimension_numbers = #tpu.dot_dimension_numbers<[1], [0], [0], [1], [0, 0, 1, 1], [], []>} : vector<32x97xbf16>, vector<97x406xbf16>, vector<32x406xf32> -> vector<32x406xf32>
    %53 = arith.truncf %52 : vector<32x406xf32> to vector<32x406xbf16>
    %54 = arith.negf %53 : vector<32x406xbf16>
    %55 = math.exp %54 : vector<32x406xbf16>
    %cst_21 = arith.constant 1.000000e+00 : bf16
    %56 = vector.broadcast %cst_21 : bf16 to vector<32x406xbf16>
    %57 = arith.addf %56, %55 : vector<32x406xbf16>
    %58 = arith.divf %56, %57 : vector<32x406xbf16>
    %59 = arith.mulf %53, %58 : vector<32x406xbf16>
    %c384_i32_22 = arith.constant 384 : i32
    %60 = arith.muli %arg1, %c384_i32_22 : i32
    %c11_i32 = arith.constant 11 : i32
    %61 = arith.subi %60, %c11_i32 : i32
    %62 = arith.extui %31 : i1 to i32
    %c0_i32_23 = arith.constant 0 : i32
    %63 = arith.cmpi ne, %62, %c0_i32_23 : i32
    %64 = scf.if %63 -> (vector<32x406xbf16>) {
      %163 = vector.extract_strided_slice %32 {offsets = [0, 0], sizes = [1, 406], strides = [1, 1]} : vector<1x512xi32> to vector<1x406xi32>
      %164 = vector.broadcast %61 : i32 to vector<1x406xi32>
      %165 = arith.addi %164, %163 : vector<1x406xi32>
      %c0_i32_63 = arith.constant 0 : i32
      %166 = vector.broadcast %c0_i32_63 : i32 to vector<1x406xi32>
      %167 = arith.cmpi sge, %165, %166 : vector<1x406xi32>
      %c300_i32_64 = arith.constant 300 : i32
      %168 = vector.broadcast %c300_i32_64 : i32 to vector<1x406xi32>
      %169 = arith.cmpi slt, %165, %168 : vector<1x406xi32>
      %170 = arith.andi %167, %169 : vector<1x406xi1>
      %cst_65 = arith.constant 0.000000e+00 : bf16
      %171 = vector.broadcast %cst_65 : bf16 to vector<32x406xbf16>
      %172 = vector.shape_cast %170 : vector<1x406xi1> to vector<1x406xi1>
      %173 = vector.broadcast %172 : vector<1x406xi1> to vector<32x406xi1>
      %174 = arith.select %173, %59, %171 : vector<32x406xi1>, vector<32x406xbf16>
      scf.yield %174 : vector<32x406xbf16>
    } else {
      scf.yield %59 : vector<32x406xbf16>
    }
    %65 = vector.extract_strided_slice %64 {offsets = [0, 0], sizes = [32, 404], strides = [1, 1]} : vector<32x406xbf16> to vector<32x404xbf16>
    %66 = vector.extract_strided_slice %64 {offsets = [0, 1], sizes = [32, 404], strides = [1, 1]} : vector<32x406xbf16> to vector<32x404xbf16>
    %67 = vector.extract_strided_slice %64 {offsets = [0, 2], sizes = [32, 404], strides = [1, 1]} : vector<32x406xbf16> to vector<32x404xbf16>
    %cst_24 = arith.constant 1.000000e+00 : bf16
    %68 = vector.broadcast %cst_24 : bf16 to vector<1x404xbf16>
    %69 = tpu.concatenate %65, %66, %67, %68 in 0 : vector<32x404xbf16>, vector<32x404xbf16>, vector<32x404xbf16>, vector<1x404xbf16> -> vector<97x404xbf16>
    %c0_25 = arith.constant 0 : index
    %c0_26 = arith.constant 0 : index
    %c0_27 = arith.constant 0 : index
    %70 = vector.load %arg4[%c0_25, %c0_26, %c0_27] : memref<3x32x97xbf16, #tpu.memory_space<vmem>>, vector<1x32x97xbf16>
    %71 = vector.shape_cast %70 : vector<1x32x97xbf16> to vector<32x97xbf16>
    %cst_28 = arith.constant dense<0.000000e+00> : vector<32x404xf32>
    %72 = tpu.matmul %71, %69, %cst_28 {dimension_numbers = #tpu.dot_dimension_numbers<[1], [0], [0], [1], [0, 0, 1, 1], [], []>} : vector<32x97xbf16>, vector<97x404xbf16>, vector<32x404xf32> -> vector<32x404xf32>
    %73 = vector.extract_strided_slice %37 {offsets = [0, 2], sizes = [32, 404], strides = [1, 1]} : vector<32x408xf32> to vector<32x404xf32>
    %74 = arith.addf %72, %73 : vector<32x404xf32>
    %c384_i32_29 = arith.constant 384 : i32
    %75 = arith.muli %arg1, %c384_i32_29 : i32
    %c10_i32 = arith.constant 10 : i32
    %76 = arith.subi %75, %c10_i32 : i32
    %77 = arith.extui %31 : i1 to i32
    %c0_i32_30 = arith.constant 0 : i32
    %78 = arith.cmpi ne, %77, %c0_i32_30 : i32
    %79 = scf.if %78 -> (vector<32x404xf32>) {
      %163 = vector.extract_strided_slice %32 {offsets = [0, 0], sizes = [1, 404], strides = [1, 1]} : vector<1x512xi32> to vector<1x404xi32>
      %164 = vector.broadcast %76 : i32 to vector<1x404xi32>
      %165 = arith.addi %164, %163 : vector<1x404xi32>
      %c0_i32_63 = arith.constant 0 : i32
      %166 = vector.broadcast %c0_i32_63 : i32 to vector<1x404xi32>
      %167 = arith.cmpi sge, %165, %166 : vector<1x404xi32>
      %c300_i32_64 = arith.constant 300 : i32
      %168 = vector.broadcast %c300_i32_64 : i32 to vector<1x404xi32>
      %169 = arith.cmpi slt, %165, %168 : vector<1x404xi32>
      %170 = arith.andi %167, %169 : vector<1x404xi1>
      %cst_65 = arith.constant 0.000000e+00 : f32
      %171 = vector.broadcast %cst_65 : f32 to vector<32x404xf32>
      %172 = vector.shape_cast %170 : vector<1x404xi1> to vector<1x404xi1>
      %173 = vector.broadcast %172 : vector<1x404xi1> to vector<32x404xi1>
      %174 = arith.select %173, %74, %171 : vector<32x404xi1>, vector<32x404xf32>
      scf.yield %174 : vector<32x404xf32>
    } else {
      scf.yield %74 : vector<32x404xf32>
    }
    %80 = arith.truncf %79 : vector<32x404xf32> to vector<32x404xbf16>
    %81 = arith.negf %80 : vector<32x404xbf16>
    %82 = math.exp %81 : vector<32x404xbf16>
    %cst_31 = arith.constant 1.000000e+00 : bf16
    %83 = vector.broadcast %cst_31 : bf16 to vector<32x404xbf16>
    %84 = arith.addf %83, %82 : vector<32x404xbf16>
    %85 = arith.divf %83, %84 : vector<32x404xbf16>
    %86 = arith.mulf %80, %85 : vector<32x404xbf16>
    %87 = vector.extract_strided_slice %86 {offsets = [0, 0], sizes = [32, 398], strides = [1, 1]} : vector<32x404xbf16> to vector<32x398xbf16>
    %88 = vector.extract_strided_slice %86 {offsets = [0, 3], sizes = [32, 398], strides = [1, 1]} : vector<32x404xbf16> to vector<32x398xbf16>
    %89 = vector.extract_strided_slice %86 {offsets = [0, 6], sizes = [32, 398], strides = [1, 1]} : vector<32x404xbf16> to vector<32x398xbf16>
    %cst_32 = arith.constant 1.000000e+00 : bf16
    %90 = vector.broadcast %cst_32 : bf16 to vector<1x398xbf16>
    %91 = tpu.concatenate %87, %88, %89, %90 in 0 : vector<32x398xbf16>, vector<32x398xbf16>, vector<32x398xbf16>, vector<1x398xbf16> -> vector<97x398xbf16>
    %c1 = arith.constant 1 : index
    %c0_33 = arith.constant 0 : index
    %c0_34 = arith.constant 0 : index
    %92 = vector.load %arg3[%c1, %c0_33, %c0_34] : memref<3x32x97xbf16, #tpu.memory_space<vmem>>, vector<1x32x97xbf16>
    %93 = vector.shape_cast %92 : vector<1x32x97xbf16> to vector<32x97xbf16>
    %cst_35 = arith.constant dense<0.000000e+00> : vector<32x398xf32>
    %94 = tpu.matmul %93, %91, %cst_35 {dimension_numbers = #tpu.dot_dimension_numbers<[1], [0], [0], [1], [0, 0, 1, 1], [], []>} : vector<32x97xbf16>, vector<97x398xbf16>, vector<32x398xf32> -> vector<32x398xf32>
    %95 = arith.truncf %94 : vector<32x398xf32> to vector<32x398xbf16>
    %96 = arith.negf %95 : vector<32x398xbf16>
    %97 = math.exp %96 : vector<32x398xbf16>
    %cst_36 = arith.constant 1.000000e+00 : bf16
    %98 = vector.broadcast %cst_36 : bf16 to vector<32x398xbf16>
    %99 = arith.addf %98, %97 : vector<32x398xbf16>
    %100 = arith.divf %98, %99 : vector<32x398xbf16>
    %101 = arith.mulf %95, %100 : vector<32x398xbf16>
    %c384_i32_37 = arith.constant 384 : i32
    %102 = arith.muli %arg1, %c384_i32_37 : i32
    %c7_i32 = arith.constant 7 : i32
    %103 = arith.subi %102, %c7_i32 : i32
    %104 = arith.extui %31 : i1 to i32
    %c0_i32_38 = arith.constant 0 : i32
    %105 = arith.cmpi ne, %104, %c0_i32_38 : i32
    %106 = scf.if %105 -> (vector<32x398xbf16>) {
      %163 = vector.extract_strided_slice %32 {offsets = [0, 0], sizes = [1, 398], strides = [1, 1]} : vector<1x512xi32> to vector<1x398xi32>
      %164 = vector.broadcast %103 : i32 to vector<1x398xi32>
      %165 = arith.addi %164, %163 : vector<1x398xi32>
      %c0_i32_63 = arith.constant 0 : i32
      %166 = vector.broadcast %c0_i32_63 : i32 to vector<1x398xi32>
      %167 = arith.cmpi sge, %165, %166 : vector<1x398xi32>
      %c300_i32_64 = arith.constant 300 : i32
      %168 = vector.broadcast %c300_i32_64 : i32 to vector<1x398xi32>
      %169 = arith.cmpi slt, %165, %168 : vector<1x398xi32>
      %170 = arith.andi %167, %169 : vector<1x398xi1>
      %cst_65 = arith.constant 0.000000e+00 : bf16
      %171 = vector.broadcast %cst_65 : bf16 to vector<32x398xbf16>
      %172 = vector.shape_cast %170 : vector<1x398xi1> to vector<1x398xi1>
      %173 = vector.broadcast %172 : vector<1x398xi1> to vector<32x398xi1>
      %174 = arith.select %173, %101, %171 : vector<32x398xi1>, vector<32x398xbf16>
      scf.yield %174 : vector<32x398xbf16>
    } else {
      scf.yield %101 : vector<32x398xbf16>
    }
    %107 = vector.extract_strided_slice %106 {offsets = [0, 0], sizes = [32, 396], strides = [1, 1]} : vector<32x398xbf16> to vector<32x396xbf16>
    %108 = vector.extract_strided_slice %106 {offsets = [0, 1], sizes = [32, 396], strides = [1, 1]} : vector<32x398xbf16> to vector<32x396xbf16>
    %109 = vector.extract_strided_slice %106 {offsets = [0, 2], sizes = [32, 396], strides = [1, 1]} : vector<32x398xbf16> to vector<32x396xbf16>
    %cst_39 = arith.constant 1.000000e+00 : bf16
    %110 = vector.broadcast %cst_39 : bf16 to vector<1x396xbf16>
    %111 = tpu.concatenate %107, %108, %109, %110 in 0 : vector<32x396xbf16>, vector<32x396xbf16>, vector<32x396xbf16>, vector<1x396xbf16> -> vector<97x396xbf16>
    %c1_40 = arith.constant 1 : index
    %c0_41 = arith.constant 0 : index
    %c0_42 = arith.constant 0 : index
    %112 = vector.load %arg4[%c1_40, %c0_41, %c0_42] : memref<3x32x97xbf16, #tpu.memory_space<vmem>>, vector<1x32x97xbf16>
    %113 = vector.shape_cast %112 : vector<1x32x97xbf16> to vector<32x97xbf16>
    %cst_43 = arith.constant dense<0.000000e+00> : vector<32x396xf32>
    %114 = tpu.matmul %113, %111, %cst_43 {dimension_numbers = #tpu.dot_dimension_numbers<[1], [0], [0], [1], [0, 0, 1, 1], [], []>} : vector<32x97xbf16>, vector<97x396xbf16>, vector<32x396xf32> -> vector<32x396xf32>
    %115 = vector.extract_strided_slice %79 {offsets = [0, 4], sizes = [32, 396], strides = [1, 1]} : vector<32x404xf32> to vector<32x396xf32>
    %116 = arith.addf %114, %115 : vector<32x396xf32>
    %c384_i32_44 = arith.constant 384 : i32
    %117 = arith.muli %arg1, %c384_i32_44 : i32
    %c6_i32 = arith.constant 6 : i32
    %118 = arith.subi %117, %c6_i32 : i32
    %119 = arith.extui %31 : i1 to i32
    %c0_i32_45 = arith.constant 0 : i32
    %120 = arith.cmpi ne, %119, %c0_i32_45 : i32
    %121 = scf.if %120 -> (vector<32x396xf32>) {
      %163 = vector.extract_strided_slice %32 {offsets = [0, 0], sizes = [1, 396], strides = [1, 1]} : vector<1x512xi32> to vector<1x396xi32>
      %164 = vector.broadcast %118 : i32 to vector<1x396xi32>
      %165 = arith.addi %164, %163 : vector<1x396xi32>
      %c0_i32_63 = arith.constant 0 : i32
      %166 = vector.broadcast %c0_i32_63 : i32 to vector<1x396xi32>
      %167 = arith.cmpi sge, %165, %166 : vector<1x396xi32>
      %c300_i32_64 = arith.constant 300 : i32
      %168 = vector.broadcast %c300_i32_64 : i32 to vector<1x396xi32>
      %169 = arith.cmpi slt, %165, %168 : vector<1x396xi32>
      %170 = arith.andi %167, %169 : vector<1x396xi1>
      %cst_65 = arith.constant 0.000000e+00 : f32
      %171 = vector.broadcast %cst_65 : f32 to vector<32x396xf32>
      %172 = vector.shape_cast %170 : vector<1x396xi1> to vector<1x396xi1>
      %173 = vector.broadcast %172 : vector<1x396xi1> to vector<32x396xi1>
      %174 = arith.select %173, %116, %171 : vector<32x396xi1>, vector<32x396xf32>
      scf.yield %174 : vector<32x396xf32>
    } else {
      scf.yield %116 : vector<32x396xf32>
    }
    %122 = arith.truncf %121 : vector<32x396xf32> to vector<32x396xbf16>
    %123 = arith.negf %122 : vector<32x396xbf16>
    %124 = math.exp %123 : vector<32x396xbf16>
    %cst_46 = arith.constant 1.000000e+00 : bf16
    %125 = vector.broadcast %cst_46 : bf16 to vector<32x396xbf16>
    %126 = arith.addf %125, %124 : vector<32x396xbf16>
    %127 = arith.divf %125, %126 : vector<32x396xbf16>
    %128 = arith.mulf %122, %127 : vector<32x396xbf16>
    %129 = vector.extract_strided_slice %128 {offsets = [0, 0], sizes = [32, 386], strides = [1, 1]} : vector<32x396xbf16> to vector<32x386xbf16>
    %130 = vector.extract_strided_slice %128 {offsets = [0, 5], sizes = [32, 386], strides = [1, 1]} : vector<32x396xbf16> to vector<32x386xbf16>
    %131 = vector.extract_strided_slice %128 {offsets = [0, 10], sizes = [32, 386], strides = [1, 1]} : vector<32x396xbf16> to vector<32x386xbf16>
    %cst_47 = arith.constant 1.000000e+00 : bf16
    %132 = vector.broadcast %cst_47 : bf16 to vector<1x386xbf16>
    %133 = tpu.concatenate %129, %130, %131, %132 in 0 : vector<32x386xbf16>, vector<32x386xbf16>, vector<32x386xbf16>, vector<1x386xbf16> -> vector<97x386xbf16>
    %c2 = arith.constant 2 : index
    %c0_48 = arith.constant 0 : index
    %c0_49 = arith.constant 0 : index
    %134 = vector.load %arg3[%c2, %c0_48, %c0_49] : memref<3x32x97xbf16, #tpu.memory_space<vmem>>, vector<1x32x97xbf16>
    %135 = vector.shape_cast %134 : vector<1x32x97xbf16> to vector<32x97xbf16>
    %cst_50 = arith.constant dense<0.000000e+00> : vector<32x386xf32>
    %136 = tpu.matmul %135, %133, %cst_50 {dimension_numbers = #tpu.dot_dimension_numbers<[1], [0], [0], [1], [0, 0, 1, 1], [], []>} : vector<32x97xbf16>, vector<97x386xbf16>, vector<32x386xf32> -> vector<32x386xf32>
    %137 = arith.truncf %136 : vector<32x386xf32> to vector<32x386xbf16>
    %138 = arith.negf %137 : vector<32x386xbf16>
    %139 = math.exp %138 : vector<32x386xbf16>
    %cst_51 = arith.constant 1.000000e+00 : bf16
    %140 = vector.broadcast %cst_51 : bf16 to vector<32x386xbf16>
    %141 = arith.addf %140, %139 : vector<32x386xbf16>
    %142 = arith.divf %140, %141 : vector<32x386xbf16>
    %143 = arith.mulf %137, %142 : vector<32x386xbf16>
    %c384_i32_52 = arith.constant 384 : i32
    %144 = arith.muli %arg1, %c384_i32_52 : i32
    %c1_i32_53 = arith.constant 1 : i32
    %145 = arith.subi %144, %c1_i32_53 : i32
    %146 = arith.extui %31 : i1 to i32
    %c0_i32_54 = arith.constant 0 : i32
    %147 = arith.cmpi ne, %146, %c0_i32_54 : i32
    %148 = scf.if %147 -> (vector<32x386xbf16>) {
      %163 = vector.extract_strided_slice %32 {offsets = [0, 0], sizes = [1, 386], strides = [1, 1]} : vector<1x512xi32> to vector<1x386xi32>
      %164 = vector.broadcast %145 : i32 to vector<1x386xi32>
      %165 = arith.addi %164, %163 : vector<1x386xi32>
      %c0_i32_63 = arith.constant 0 : i32
      %166 = vector.broadcast %c0_i32_63 : i32 to vector<1x386xi32>
      %167 = arith.cmpi sge, %165, %166 : vector<1x386xi32>
      %c300_i32_64 = arith.constant 300 : i32
      %168 = vector.broadcast %c300_i32_64 : i32 to vector<1x386xi32>
      %169 = arith.cmpi slt, %165, %168 : vector<1x386xi32>
      %170 = arith.andi %167, %169 : vector<1x386xi1>
      %cst_65 = arith.constant 0.000000e+00 : bf16
      %171 = vector.broadcast %cst_65 : bf16 to vector<32x386xbf16>
      %172 = vector.shape_cast %170 : vector<1x386xi1> to vector<1x386xi1>
      %173 = vector.broadcast %172 : vector<1x386xi1> to vector<32x386xi1>
      %174 = arith.select %173, %143, %171 : vector<32x386xi1>, vector<32x386xbf16>
      scf.yield %174 : vector<32x386xbf16>
    } else {
      scf.yield %143 : vector<32x386xbf16>
    }
    %149 = vector.extract_strided_slice %148 {offsets = [0, 0], sizes = [32, 384], strides = [1, 1]} : vector<32x386xbf16> to vector<32x384xbf16>
    %150 = vector.extract_strided_slice %148 {offsets = [0, 1], sizes = [32, 384], strides = [1, 1]} : vector<32x386xbf16> to vector<32x384xbf16>
    %151 = vector.extract_strided_slice %148 {offsets = [0, 2], sizes = [32, 384], strides = [1, 1]} : vector<32x386xbf16> to vector<32x384xbf16>
    %cst_55 = arith.constant 1.000000e+00 : bf16
    %152 = vector.broadcast %cst_55 : bf16 to vector<1x384xbf16>
    %153 = tpu.concatenate %149, %150, %151, %152 in 0 : vector<32x384xbf16>, vector<32x384xbf16>, vector<32x384xbf16>, vector<1x384xbf16> -> vector<97x384xbf16>
    %c2_56 = arith.constant 2 : index
    %c0_57 = arith.constant 0 : index
    %c0_58 = arith.constant 0 : index
    %154 = vector.load %arg4[%c2_56, %c0_57, %c0_58] : memref<3x32x97xbf16, #tpu.memory_space<vmem>>, vector<1x32x97xbf16>
    %155 = vector.shape_cast %154 : vector<1x32x97xbf16> to vector<32x97xbf16>
    %cst_59 = arith.constant dense<0.000000e+00> : vector<32x384xf32>
    %156 = tpu.matmul %155, %153, %cst_59 {dimension_numbers = #tpu.dot_dimension_numbers<[1], [0], [0], [1], [0, 0, 1, 1], [], []>} : vector<32x97xbf16>, vector<97x384xbf16>, vector<32x384xf32> -> vector<32x384xf32>
    %157 = vector.extract_strided_slice %121 {offsets = [0, 6], sizes = [32, 384], strides = [1, 1]} : vector<32x396xf32> to vector<32x384xf32>
    %158 = arith.addf %156, %157 : vector<32x384xf32>
    %159 = arith.truncf %158 : vector<32x384xf32> to vector<32x384xbf16>
    %c0_60 = arith.constant 0 : index
    %c0_61 = arith.constant 0 : index
    %c0_62 = arith.constant 0 : index
    %160 = vector.load %arg5[%c0_60, %c0_61, %c0_62] : memref<1x32x384xbf16, #tpu.memory_space<vmem>>, vector<1x32x384xbf16>
    %161 = vector.shape_cast %160 : vector<1x32x384xbf16> to vector<32x384xbf16>
    %162 = vector.shape_cast %159 : vector<32x384xbf16> to vector<1x32x384xbf16>
    tpu.vector_store %arg5[%c0_60, %c0_61, %c0_62], %162 {strides = array<i32>} : memref<1x32x384xbf16, #tpu.memory_space<vmem>>, vector<1x32x384xbf16>,
    return
  }
  func.func @transform_1(%arg0: i32, %arg1: i32) -> (i32, i32, i32) {
    %c0_i32 = arith.constant 0 : i32
    %c0_i32_0 = arith.constant 0 : i32
    %c0_i32_1 = arith.constant 0 : i32
    %c0_i32_2 = arith.constant 0 : i32
    return %c0_i32, %c0_i32_0, %c0_i32_1 : i32, i32, i32
  }
  func.func @transform_2(%arg0: i32, %arg1: i32) -> (i32, i32, i32) {
    %c0_i32 = arith.constant 0 : i32
    %c0_i32_0 = arith.constant 0 : i32
    %c0_i32_1 = arith.constant 0 : i32
    %c0_i32_2 = arith.constant 0 : i32
    return %c0_i32, %c0_i32_0, %c0_i32_1 : i32, i32, i32
  }
  func.func @transform_3(%arg0: i32, %arg1: i32) -> (i32, i32, i32) {
    %c0_i32 = arith.constant 0 : i32
    %c0_i32_0 = arith.constant 0 : i32
    return %arg0, %c0_i32, %arg1 : i32, i32, i32
  }
}

</mosaic_0001>

<bundles_post_ra>
// kernel: tpu_custom_call.1
= control target key start
LH: loop header
LB: loop body
LE: loop exit
PB: predicated region body
PF: predicated region fallthrough
CT: control target
= control target key end

     0   :  { %8 = vsyncpa [#allocation5], 0  ;;  %s4432_s0 = inlined_call_operand.hbm [shape: bf16[2,32,512], index: 0, kind: input, shape index: {}]   ;;  %s4433_s1 = inlined_call_operand.hbm [shape: bf16[3,32,97], index: 1, kind: input, shape index: {}]   ;;  %s4434_s2 = inlined_call_operand.hbm [shape: bf16[3,32,97], index: 2, kind: input, shape index: {}]   ;;  %s4435_s3 = inlined_call_operand.hbm [shape: bf16[2,32,300], index: 3, kind: output, shape index: {}]  }
   0x1   :  { %9 = vsyncpa [#allocation8], 0 }
   0x2   :  { %10 = vsyncpa [#allocation6], 0 }
   0x3   :  { %12 = vsyncpa [#allocation6 + $0x1], 0  ;;  %s3446_s12 = smov 0   ;;  %s3448_s13 = smov 0  }
   0x4   :  { %s3450_s14 = smov 0   ;;  %s3452_s15 = smov 0  }
   0x5   :  { %s3454_s16 = smov 0   ;;  %s3456_s17 = smov 0  }
   0x6 LB: > { %s2734_s18 = sadd.s32 4294967295, %s3396_s17   ;;  %s2735_s19 = sadd.s32 4294967294, %s3396_s17   ;;  %s3396_s17 = sphi %s3456_s17, %s18_s17   ;;  %s3392_s16 = sphi %s3454_s16, %s4477_s16   ;;  %s3388_s15 = sphi %s3452_s15, %s4476_s15   ;;  %s3384_s14 = sphi %s3450_s14, %s4475_s14   ;;  %s3380_s13 = sphi %s3448_s13, %s4474_s13   ;;  %s3376_s12 = sphi %s3446_s12, %s4473_s12  }
   0x7   : > { %s30_s20 = sadd.s32 1, %s3392_s16  ;;  %s81_s21 = sadd.s32 1, %s3384_s14 }
   0x8   : > { %p32_p0 = scmp.ge.s32.totalorder %s30_s20, 2  ;;  %p91_p1 = scmp.ne.s32.totalorder %s3384_s14, %s3380_s13 }
   0x9   : > { %p92_p2 = scmp.eq.s32.totalorder %s2734_s18, 1  ;;  %p97_p3 = scmp.ne.s32.totalorder %s3380_s13, %s3376_s12 }
   0xa   : > { %s4479_s20 = smov (%p32_p0, %s30_s20), 0  ;;  %p98_p5 = scmp.eq.s32.totalorder %s2735_s19, 1 }
   0xb   : > { %p3486_p4 = por %p92_p2, %p91_p1  ;;  %s76_s23 = ssub.s32 %s3392_s16, %s4479_s20 }
   0xc   : > { %p2736_p6 = scmp.ge.s32.totalorder %s3396_s17, 1  ;;  %p79_p7 = scmp.eq.s32.totalorder %s76_s23, 0 }
   0xd   : > { %s4440_s22 = scalar_select %p3486_p4, 1, 0 }
   0xe   : > { %p3493_p8 = por %p98_p5, %p97_p3  ;;  %p105_p9 = scmp.lt.s32.totalorder %s3396_s17, 3 }
   0xf   : > { %s3499_s25 = scalar_select %p79_p7, %s3384_s14, %s81_s21  }
  0x10   : > { %s4441_s24 = scalar_select %p3493_p8, 1, 0 }
  0x11   : > { %p3501_p10 = pnand %p2736_p6, %p105_p9  ;;  %p3505_p11 = scmp.eq.s32.totalorder %s2734_s18, 0 }
  0x12   : > { %s3398_s28 = smov [#allocation4]   ;;  %s3399_s4 = smov [#allocation7]  }
  0x13   : > { %s4442_s26 = scalar_select %p3501_p10, 1, 0 }
  0x14   : > { %s4443_s27 = scalar_select %p3505_p11, 1, 0 }
  0x15   : > { %p2909_p12 = pneg %p3501_p10  ;;  %s117_s29 = sshll.u32 %s3398_s28, 4  ;;  %s118_s29 = int_to_ptr.vmem [resolvable:$true] %s117_s29 }
  0x16   : > { %s130_s5 = sshll.u32 %s3399_s4, 4  ;;  %s3252_s8 = scalar_lea.hbm %s4433_s1, 768  ;;  %s3517_s5 = int_to_ptr.vmem [resolvable:$true] %s130_s5 }
  0x17   : > { %p3513_p13 = pnand %p3505_p11, %p2909_p12  ;;  %p3253_p0 = scmp.ne.s32.totalorder %s4433_s1, %s3252_s8 }
  0x18   : > { %p3259_p5 = scmp.lt.u32.totalorder %s3252_s8, %s4433_s1 }
  0x19   : > { %p3254_p1 = pneg %p3513_p13 }
  0x1b   : > { %p3255_p2 = pnand %p3254_p1, %p3253_p0 }
  0x1d   : > { %p3256_p3 = pneg %p3255_p2 }
  0x1f   : > { %p3261_p6 = pnand %p3259_p5, %p3256_p3 }
  0x21   : > { %3264 = shalt.err (!%p3261_p6)
}
  0x22   : > { %s3265_s19 = scalar_lea.vmem %s118_s29, 768  ;;  %p3273_p8 = scmp.lt.s32.totalorder %s118_s29, %s118_s29 }
  0x23   : > { %p3266_p7 = scmp.ne.s32.totalorder %s118_s29, %s3265_s19  ;;  %p3274_p4 = scmp.lt.s32.totalorder %s3265_s19, %s3265_s19 }
  0x25   : > { %p3268_p9 = pnand %p3266_p7, %p3254_p1  ;;  %p3275_p11 = por %p3274_p4, %p3273_p8 }
  0x27   : > { %p3269_p12 = pneg %p3268_p9 }
  0x29   : > { %p3276_p10 = pnand %p3275_p11, %p3269_p12 }
  0x2b   : > { %3279 = shalt.err (!%p3276_p10)
}
  0x2c   : > { %s3400_s21 = smov 64   ;;  %s3401_s23 = smov 4  }
  0x2d   : > { %2912 = dma.hbm_to_vmem [thread:$0]  (!%p3513_p13), %s4433_s1, 768, %s118_s29, [#allocation5], %s3400_s21, %s3400_s21, %s3401_s23  }
  0x2e   : > { %s3280_s8 = scalar_lea.hbm %s4434_s2, 768 }
  0x2f   : > { %p3281_p0 = scmp.ne.s32.totalorder %s4434_s2, %s3280_s8  ;;  %p3287_p10 = scmp.lt.u32.totalorder %s3280_s8, %s4434_s2 }
  0x31   : > { %p3283_p4 = pnand %p3281_p0, %p3254_p1 }
  0x33   : > { %p3284_p8 = pneg %p3283_p4 }
  0x35   : > { %p3289_p11 = pnand %p3287_p10, %p3284_p8 }
  0x37   : > { %3292 = shalt.err (!%p3289_p11)
}
  0x38   : > { %s3293_s29 = scalar_lea.vmem %s3517_s5, 768  ;;  %p3301_p6 = scmp.lt.s32.totalorder %s3517_s5, %s3517_s5 }
  0x39   : > { %p3294_p2 = scmp.ne.s32.totalorder %s3517_s5, %s3293_s29  ;;  %p3302_p7 = scmp.lt.s32.totalorder %s3293_s29, %s3293_s29 }
  0x3b   : > { %p3296_p3 = pnand %p3294_p2, %p3254_p1  ;;  %p3303_p9 = por %p3302_p7, %p3301_p6 }
  0x3d   : > { %p3297_p5 = pneg %p3296_p3 }
  0x3f   : > { %p3304_p12 = pnand %p3303_p9, %p3297_p5 }
  0x41   : > { %3307 = shalt.err (!%p3304_p12)
}
  0x42   : > { %2915 = dma.hbm_to_vmem [thread:$0]  (!%p3513_p13), %s4434_s2, 768, %s3517_s5, [#allocation8], %s3400_s21, %s3400_s21, %s3401_s23  }
  0x43   : > { %p4445_p0 = scmp.ne.s32.totalorder %s4442_s26, 0 }
  0x44   : > { %p4446_p4 = scmp.ne.s32.totalorder (!%p4445_p0), %s4443_s27, 0 }
  0x45   : > { %146 = sbr.rel (%p4445_p0) target bundleno = 2527 (0x9df), region = 28 }
  0x4c   : > { %3361 = dma.done.wait (%p4446_p4), [#allocation5], 768  }
  0x4d   : > { %3363 = vsyncadd (%p4446_p4), [#allocation5], 4294966528 }
  0x4e   : > { %3365 = dma.done.wait (%p4446_p4), [#allocation8], 768  }
  0x4f   : > { %3367 = vsyncadd (%p4446_p4), [#allocation8], 4294966528  ;;  %s164_s30 = sand.u32 1, %s3380_s13  }
  0x50   : > { %s2897_s5 = smul.u32 48, %s164_s30 }
  0x52   : > { %s3579_s21 = scalar_lea.vmem [#allocation9], %s2897_s5 }
  0x53   : > { %s2847_s26 = sshll.u32 %s3388_s15, 10  ;;  %s187_s23 = sld [smem:[#allocation0]]  }
  0x54   : > { %s182_s7 = scalar_lea.hbm %s4432_s0, %s2847_s26  ;;  %s3402_s8 = smov [#allocation2]  }
  0x55   : > { %s195_s9 = sshll.u32 %s3402_s8, 4  ;;  %s3403_s10 = smov 512   ;;  %s196_s9 = int_to_ptr.vmem [resolvable:$true] %s195_s9 }
  0x56   : > { %199 = sst [smem:[#allocation11]] %s3403_s10  ;;  %s3404_s27 = smov 4  }
  0x57   : > { %201 = sst [smem:[#allocation11 + $0x1]] %s3403_s10  ;;  %s3405_s18 = smov 64  }
  0x58   : > { %203 = sst [smem:[#allocation11 + $0x2]] %s3404_s27  ;;  %s3406_s19 = smov 128  }
  0x59   : > { %s2744_s11 = sshll.u32 %s187_s23, 26  ;;  %205 = sst [smem:[#allocation11 + $0x3]] %s3405_s18 }
  0x5a   : > { %s2745_s29 = sadd.s32 134217728, %s2744_s11  ;;  %207 = sst [smem:[#allocation11 + $0x4]] %s3406_s19 }
  0x5b   : > { %s3407_s28 = smov 2   ;;  %s3408_s5 = smov 256  }
  0x5c   : > { %209 = sst [smem:[#allocation11 + $0x5]] %s3407_s28  ;;  %s3409_s26 = smov [#allocation3]  }
  0x5d   : > { %211 = sst [smem:[#allocation11 + $0x6]] %s3408_s5  ;;  %s3410_s4 = smov [#allocation10]  }
  0x5e   : > { %213 = sst [smem:[#allocation11 + $0x7]] %s3405_s18 }
  0x5f   : > { %215 = sst [smem:[#allocation11 + $0x8]] %s3404_s27 }
  0x60   : > { %217 = dma.general %s182_s7, 1024, %s196_s9, %s3409_s26, %s3410_s4, [#allocation11], %s2745_s29, 0  }
  0x61   : > { %3368 = dma.done.wait [#allocation3], 1024 }
  0x62   : > { %3369 = vsyncadd [#allocation3], 4294966272  ;;  %v3585_v0 = vld [vmem:[#allocation2 + $0x8] sm:$0xff]  ;;  %v3587_v1 = vld [vmem:[#allocation2] sm:$0xff]  ;;  %s3411_s23 = smov 127   ;;  %s3412_s6 = smov 126  }
  0x63   : > { %v3589_v2 = vld [vmem:[#allocation2 + $0x10] sm:$0xff]  ;;  %v2751_v3 = vmul.bf16 3216621497, %v3585_v0  ;;  %v2750_v4 = vmul.bf16 3216621497, %v3587_v1  ;;  %v3594_v6 = vld [vmem:[#allocation2 + $0x18] sm:$0xff] }
  0x64   : > { %v2752_v5 = vmul.bf16 3216621497, %v3589_v2  ;;  %v3596_v7 = vld [vmem:[#allocation2 + $0x28] sm:$0xff]  ;;  %v3598_v8 = vld [vmem:[#allocation2 + $0x30] sm:$0xff]  ;;  %v2753_v9 = vmul.bf16 3216621497, %v3594_v6 }
  0x65   : > { %3072 = vpow.bf16 %v2751_v3  ;;  %v2755_v10 = vmul.bf16 3216621497, %v3596_v7  ;;  %v2756_v11 = vmul.bf16 3216621497, %v3598_v8  ;;  %v3603_v12 = vld [vmem:[#allocation2 + $0x20] sm:$0xff]  ;;  %v3605_v13 = vld [vmem:[#allocation2 + $0x38] sm:$0xff] }
  0x66   : > { %3074 = vpow.bf16 %v2750_v4  ;;  %v2754_v14 = vmul.bf16 3216621497, %v3603_v12  ;;  %v2757_v15 = vmul.bf16 3216621497, %v3605_v13  ;;  %v3413_v56 = vmov 0   ;;  %s3417_s7 = smov 125  }
  0x67   : > { %3076 = vpow.bf16 %v2752_v5  ;;  %529 = vmatprep.mubr.bf16.mxu0 %v3413_v56  ;;  %582 = vmatprep.mubr.bf16.mxu1 %v3413_v56  ;;  %vm424_vm0 = vcmask 1039360   ;;  %vm455_vm1 = vcmask 1031168   ;;  %vm491_vm2 = vcmask 1040384   ;;  %s3418_s8 = smov 122   ;;  %s3420_s9 = smov 124  }
  0x68   : > { %3078 = vpow.bf16 %v2753_v9  ;;  %vm484_vm3 = vcmask 793600   ;;  %vm3414_vm6 = vmmov 1   ;;  %vm3415_vm8 = vmmov 0   ;;  %s3421_s10 = smov 123   ;;  %s3422_s27 = smov 118  }
  0x69   : > { %3080 = vpow.bf16 %v2755_v10  ;;  %s2898_s11 = smul.u32 768, %s3388_s15  ;;  %s2624_s18 = sshll.u32 %s3579_s21, 4  ;;  %s4380_s18 = int_to_ptr.vmem [resolvable:$true] %s2624_s18 }
  0x6a   : > { %3082 = vpow.bf16 %v2756_v11  ;;  %s4386_s28 = scalar_lea.sflag [#allocation6], %s164_s30  ;;  %s3308_s5 = scalar_lea.vmem %s4380_s18, 768 }
  0x6b   : > { %3084 = vpow.bf16 %v2754_v14  ;;  %s4378_s19 = scalar_lea.hbm %s4435_s3, %s2898_s11  ;;  %p3309_p13 = scmp.ne.s32.totalorder %s4380_s18, %s3308_s5 }
  0x6c   : > { %3086 = vpow.bf16 %v2757_v15  ;;  %p4471_p1 = scmp.ne.s32.totalorder %s4440_s22, 0  ;;  %s3423_s26 = smov [#allocation9]  }
  0x6d   : > { %s3312_s4 = sshll.u32 %s3423_s26, 4  ;;  %s3313_s4 = int_to_ptr.vmem [resolvable:$false] %s3312_s4 }
  0x6e   : > { %p3310_p8 = pnand %p3309_p13, %p4471_p1  ;;  %p3315_p11 = scmp.lt.s32.totalorder %s4380_s18, %s3313_s4 }
  0x70   : > { %v3073_v16 = vpop.eup %3072  ;;  %p3311_p10 = pneg %p3310_p8 }
  0x71   : > { %v3075_v17 = vpop.eup %3074  ;;  %v369_v18 = vadd.bf16 1065369472, %v3073_v16 }
  0x72   : > { %v3077_v19 = vpop.eup %3076  ;;  %v368_v20 = vadd.bf16 1065369472, %v3075_v17 }
  0x73   : > { %v3079_v21 = vpop.eup %3078  ;;  %3088 = vrcp.bf16 %v369_v18  ;;  %v370_v22 = vadd.bf16 1065369472, %v3077_v19 }
  0x74   : > { %v3081_v23 = vpop.eup %3080  ;;  %3090 = vrcp.bf16 %v368_v20  ;;  %v371_v24 = vadd.bf16 1065369472, %v3079_v21 }
  0x75   : > { %v3083_v25 = vpop.eup %3082  ;;  %3092 = vrcp.bf16 %v370_v22  ;;  %v373_v26 = vadd.bf16 1065369472, %v3081_v23  ;;  %v493_v23 = vsel %vm491_vm2, 65535, %v3413_v56  ;;  %vm1202_vm2 = vcmask 1022976  }
  0x76   : > { %v3085_v27 = vpop.eup %3084  ;;  %3094 = vrcp.bf16 %v371_v24  ;;  %v374_v28 = vadd.bf16 1065369472, %v3083_v25 }
  0x77   : > { %v3087_v29 = vpop.eup %3086  ;;  %3096 = vrcp.bf16 %v373_v26  ;;  %v372_v30 = vadd.bf16 1065369472, %v3085_v27  ;;  %v3646_v26 = vand.u32 1065369472, %v493_v23 }
  0x78   : > { %3098 = vrcp.bf16 %v374_v28  ;;  %v375_v31 = vadd.bf16 1065369472, %v3087_v29 }
  0x79   : > { %3100 = vrcp.bf16 %v372_v30 }
  0x7a   : > { %3102 = vrcp.bf16 %v375_v31  ;;  %v3060_v31 = vld [vmem:[#allocation4] sm:$0xff]  }
  0x7e   : > { %v3089_v32 = vpop.eup %3088 }
  0x7f   : > { %v3091_v33 = vpop.eup %3090  ;;  %v379_v34 = vmul.bf16 1065369472, %v3089_v32  ;;  %v3061_v32 = vld [vmem:[#allocation4 + $0x8] sm:$0xff]  }
  0x80   : > { %v3093_v35 = vpop.eup %3092  ;;  %v377_v36 = vmul.bf16 1065369472, %v3091_v33 }
  0x81   : > { %v3095_v37 = vpop.eup %3094  ;;  %v393_v38 = vmul.bf16 %v379_v34, %v3585_v0  ;;  %v381_v39 = vmul.bf16 1065369472, %v3093_v35 }
  0x82   : > { %v3097_v40 = vpop.eup %3096  ;;  %v392_v41 = vmul.bf16 %v377_v36, %v3587_v1  ;;  %v383_v42 = vmul.bf16 1065369472, %v3095_v37 }
  0x83   : > { %v3099_v43 = vpop.eup %3098  ;;  %410 = vrot.lane.b32.xlu0 %v393_v38, %s3411_s23  ;;  %v394_v44 = vmul.bf16 %v381_v39, %v3589_v2  ;;  %v387_v45 = vmul.bf16 1065369472, %v3097_v40  ;;  %497 = vmatprep.subr.bf16.mxu0 %v393_v38 }
  0x84   : > { %v3101_v46 = vpop.eup %3100  ;;  %408 = vrot.lane.b32.xlu1 %v392_v41, %s3411_s23  ;;  %v395_v47 = vmul.bf16 %v383_v42, %v3594_v6  ;;  %v389_v48 = vmul.bf16 1065369472, %v3099_v43  ;;  %498 = vmatpush1.bf16.msra.mxu0 %v392_v41 }
  0x85   : > { %v3103_v49 = vpop.eup %3102  ;;  %v385_v50 = vmul.bf16 1065369472, %v3101_v46  ;;  %v397_v51 = vmul.bf16 %v387_v45, %v3596_v7 }
  0x86   : > { %v391_v52 = vmul.bf16 1065369472, %v3103_v49  ;;  %550 = vmatprep.subr.bf16.mxu1 %v395_v47  ;;  %v398_v54 = vmul.bf16 %v389_v48, %v3598_v8  ;;  %v307_v48 = vlaneseq }
  0x87   : > { %412 = vrot.lane.b32.xlu0 %v394_v44, %s3411_s23  ;;  %v396_v53 = vmul.bf16 %v385_v50, %v3603_v12  ;;  %551 = vmatpush1.bf16.msra.mxu1 %v394_v44 }
  0x88   : > { %414 = vrot.lane.b32.xlu1 %v395_v47, %s3411_s23  ;;  %v399_v55 = vmul.bf16 %v391_v52, %v3605_v13  ;;  %499 = vmatprep.subr.bf16.mxu0 %v397_v51 }
  0x89   : > { %500 = vmatpush1.bf16.msra.mxu0 %v396_v53 }
  0x8a   : > { %552 = vmatprep.subr.bf16.mxu1 %v399_v55 }
  0x8b   : > { %418 = vrot.lane.b32.xlu0 %v397_v51, %s3411_s23  ;;  %553 = vmatpush1.bf16.msra.mxu1 %v398_v54 }
  0x8c   : > { %420 = vrot.lane.b32.xlu1 %v398_v54, %s3411_s23 }
  0x8f   : > { %416 = vrot.lane.b32.xlu0 %v396_v53, %s3411_s23 }
  0x90   : > { %422 = vrot.lane.b32.xlu1 %v399_v55, %s3411_s23 }
  0x93   : > { %441 = vrot.lane.b32.xlu0 %v393_v38, %s3412_s6 }
  0x94   : > { %443 = vrot.lane.b32.xlu1 %v394_v44, %s3412_s6 }
  0x97   : > { %439 = vrot.lane.b32.xlu0 %v392_v41, %s3412_s6 }
  0x98   : > { %445 = vrot.lane.b32.xlu1 %v395_v47, %s3412_s6 }
  0x9b   : > { %449 = vrot.lane.b32.xlu0 %v397_v51, %s3412_s6 }
  0x9c   : > { %451 = vrot.lane.b32.xlu1 %v398_v54, %s3412_s6 }
  0x9f   : > { %447 = vrot.lane.b32.xlu0 %v396_v53, %s3412_s6 }
  0xa0   : > { %453 = vrot.lane.b32.xlu1 %v399_v55, %s3412_s6  ;;  %v3674_v55 = vand.u32 127, %v307_v48 }
  0xf5   : > { %v411_v57 = vpop.permute.xlu0 %410 }
  0xf6   : > { %v409_v58 = vpop.permute.xlu1 %408 }
  0xf7   : > { %v425_v63 = vsel %vm424_vm0, %v409_v58, %v411_v57 }
  0xf9   : > { %v413_v59 = vpop.permute.xlu0 %412 }
  0xfa   : > { %v415_v60 = vpop.permute.xlu1 %414  ;;  %v426_v61 = vsel %vm424_vm0, %v411_v57, %v413_v59 }
  0xfb   : > { %554 = vmatprep.subr.bf16.mxu1 %v415_v60  ;;  %501 = vmatprep.subr.bf16.mxu0 %v426_v61  ;;  %v427_v62 = vsel %vm424_vm0, %v413_v59, %v415_v60 }
  0xfc   : > { %555 = vmatpush1.bf16.msra.mxu1 %v427_v62  ;;  %502 = vmatpush1.bf16.msra.mxu0 %v425_v63 }
  0xfd   : > { %v419_v3 = vpop.permute.xlu0 %418 }
  0xfe   : > { %v421_v4 = vpop.permute.xlu1 %420 }
  0xff   : > { %v429_v5 = vsel %vm424_vm0, %v419_v3, %v421_v4 }
 0x100   : > { %503 = vmatprep.subr.bf16.mxu0 %v429_v5 }
 0x101   : > { %v417_v9 = vpop.permute.xlu0 %416 }
 0x102   : > { %v423_v10 = vpop.permute.xlu1 %422  ;;  %v428_v11 = vsel %vm424_vm0, %v417_v9, %v419_v3  ;;  %v3688_v9 = vadd.s32 256, %v3674_v55 }
 0x103   : > { %556 = vmatprep.subr.bf16.mxu1 %v423_v10  ;;  %504 = vmatpush1.bf16.msra.mxu0 %v428_v11  ;;  %v430_v14 = vsel %vm424_vm0, %v421_v4, %v423_v10  ;;  %v680_v11 = vadd.s32 4294967285, %v3674_v55 }
 0x104   : > { %557 = vmatpush1.bf16.msra.mxu1 %v430_v14 }
 0x105   : > { %v442_v15 = vpop.permute.xlu0 %441  ;;  %vm684_vm4 = vcmp.ge.s32.totalorder %v680_v11, 0 }
 0x106   : > { %v444_v16 = vpop.permute.xlu1 %443  ;;  %vm704_vm7 = vmpackc.low %vm3414_vm6, %vm684_vm4  ;;  %vm1233_vm4 = vcmask 998400  }
 0x107   : > { %v457_v17 = vsel %vm455_vm1, %v442_v15, %v444_v16 }
 0x108   : > { %505 = vmatprep.subr.bf16.mxu0 %v457_v17 }
 0x109   : > { %v440_v18 = vpop.permute.xlu0 %439 }
 0x10a   : > { %v446_v19 = vpop.permute.xlu1 %445  ;;  %v456_v20 = vsel %vm455_vm1, %v440_v18, %v442_v15  ;;  %v682_v15 = vadd.s32 4294967285, %v3688_v9 }
 0x10b   : > { %558 = vmatprep.subr.bf16.mxu1 %v446_v19  ;;  %506 = vmatpush1.bf16.msra.mxu0 %v456_v20  ;;  %v458_v21 = vsel %vm455_vm1, %v444_v16, %v446_v19  ;;  %v709_v20 = vshrl.u32 %v307_v48, 7 }
 0x10c   : > { %559 = vmatpush1.bf16.msra.mxu1 %v458_v21  ;;  %vm690_vm5 = vcmp.lt.s32.totalorder %v682_v15, 300 }
 0x10d   : > { %v450_v22 = vpop.permute.xlu0 %449  ;;  %vm705_vm9 = vmpackc.low %vm3415_vm8, %vm690_vm5 }
 0x10e   : > { %v452_v24 = vpop.permute.xlu1 %451 }
 0x10f   : > { %v460_v25 = vsel %vm455_vm1, %v450_v22, %v452_v24 }
 0x110   : > { %507 = vmatprep.subr.bf16.mxu0 %v460_v25  ;;  %v3695_v25 = vsub.s32 0, %v709_v20 }
 0x111   : > { %v448_v27 = vpop.permute.xlu0 %447 }
 0x112   : > { %v454_v28 = vpop.permute.xlu1 %453  ;;  %v459_v29 = vsel %vm455_vm1, %v448_v27, %v450_v22 }
 0x113   : > { %560 = vmatprep.subr.bf16.mxu1 %v454_v28  ;;  %508 = vmatpush1.bf16.msra.mxu0 %v459_v29  ;;  %v461_v30 = vsel %vm455_vm1, %v452_v24, %v454_v28  ;;  %v706_v29 = vsel %vm704_vm7, 65537, %v3413_v56 }
 0x114   : > { %561 = vmatpush1.bf16.msra.mxu1 %v461_v30  ;;  %509 = vmatprep.subr.bf16.mxu0 %v3646_v26 }
 0x115   : > { %562 = vmatprep.subr.bf16.mxu1 %v3646_v26 }
 0x117   : > { %510 = vmatpush1.bf16.msra.mxu0 %v3646_v26 }
 0x118   : > { %563 = vmatpush1.bf16.msra.mxu1 %v3646_v26 }
 0x11a   : > { %2760 = vmatmul.mubr.msk.bf16.vlgmr.msra.gmra.mrb[0].mxu0 %vm484_vm3, %v3060_v31 }
 0x11b   : > { %2762 = vmatmul.mubr.msk.bf16.vlgmr.msra.gmra.mrb[0].mxu1 %vm484_vm3, %v3060_v31  ;;  %539 = vmatprep.mubr.bf16.mxu0 %v3413_v56 }
 0x11c   : > { %592 = vmatprep.mubr.bf16.mxu1 %v3413_v56 }
 0x122   : > { %2761 = vmatmul.mubr.msk.bf16.gmra.mrb[4].mxu0 %vm484_vm3, %v3061_v32 }
 0x123   : > { %2763 = vmatmul.mubr.msk.bf16.gmra.mrb[4].mxu1 %vm484_vm3, %v3061_v32  ;;  %952 = vmatprep.mubr.bf16.mxu0 %v3413_v56  ;;  %v707_v32 = vsel %vm705_vm9, 65537, %v3413_v56 }
 0x124   : > { %1005 = vmatprep.mubr.bf16.mxu1 %v3413_v56 }
 0x1ed   : > { %v531_v33 = vpop.f32.mrb[0].mxu0 }
 0x1ee   : > { %v584_v34 = vpop.f32.mrb[0].mxu1  ;;  %v533_v35 = vpop.f32.mrb[1].mxu0 }
 0x1ef   : > { %v586_v36 = vpop.f32.mrb[1].mxu1  ;;  %v535_v37 = vpop.f32.mrb[2].mxu0 }
 0x1f0   : > { %v3662_v38 = vpack.c.bf16 %v535_v37, %v531_v33  ;;  %v588_v39 = vpop.f32.mrb[2].mxu1  ;;  %v537_v40 = vpop.f32.mrb[3].mxu0  ;;  %v3699_v33 = vsub.s32 4, %v709_v20  ;;  %v711_v37 = vrot.slane %v706_v29, %v3695_v25 }
 0x1f1   : > { %v3664_v41 = vpack.c.bf16 %v588_v39, %v584_v34  ;;  %v3666_v42 = vpack.c.bf16 %v537_v40, %v533_v35  ;;  %v590_v43 = vpop.f32.mrb[3].mxu1  ;;  %v719_v39 = vrot.slane %v707_v32, %v3695_v25 }
 0x1f2   : > { %v2764_v44 = vmul.bf16 3216621497, %v3662_v38  ;;  %v3669_v45 = vpack.c.bf16 %v590_v43, %v586_v36  ;;  %v715_v43 = vrot.slane %v706_v29, %v3699_v33  ;;  %vm3705_vm10 = vcmp.ne.s16.totalorder %v711_v37, 0 }
 0x1f3   : > { %v2766_v46 = vmul.bf16 3216621497, %v3664_v41  ;;  %v2765_v47 = vmul.bf16 3216621497, %v3666_v42  ;;  %vm3710_vm11 = vcmp.ne.s16.totalorder %v719_v39, 0  ;;  %v323_v29 = vunpack.c.l.bf16 %v3594_v6 }
 0x1f4   : > { %3104 = vpow.bf16 %v2764_v44  ;;  %v2767_v49 = vmul.bf16 3216621497, %v3669_v45  ;;  %vm3715_vm12 = vcmp.ne.s16.totalorder %v715_v43, 0  ;;  %v334_v37 = vunpack.c.h.bf16 %v3598_v8 }
 0x1f5   : > { %3106 = vpow.bf16 %v2766_v46  ;;  %v541_v50 = vpop.f32.mrb[4].mxu0  ;;  %v335_v39 = vunpack.c.h.bf16 %v3605_v13  ;;  %v331_v43 = vunpack.c.l.bf16 %v3605_v13 }
 0x1f6   : > { %3108 = vpow.bf16 %v2765_v47  ;;  %v594_v51 = vpop.f32.mrb[4].mxu1  ;;  %v543_v52 = vpop.f32.mrb[5].mxu0  ;;  %v723_v47 = vrot.slane %v707_v32, %v3699_v33  ;;  %v320_v32 = vunpack.c.l.bf16 %v3587_v1 }
 0x1f7   : > { %3110 = vpow.bf16 %v2767_v49  ;;  %v596_v53 = vpop.f32.mrb[5].mxu1  ;;  %v545_v54 = vpop.f32.mrb[6].mxu0 }
 0x1f8   : > { %v3676_v57 = vpack.c.bf16 %v545_v54, %v541_v50  ;;  %v598_v58 = vpop.f32.mrb[6].mxu1  ;;  %v547_v59 = vpop.f32.mrb[7].mxu0  ;;  %vm3720_vm13 = vcmp.ne.s16.totalorder %v723_v47, 0  ;;  %v328_v47 = vunpack.c.l.bf16 %v3603_v12 }
 0x1f9   : > { %v3678_v60 = vpack.c.bf16 %v598_v58, %v594_v51  ;;  %v3680_v61 = vpack.c.bf16 %v547_v59, %v543_v52  ;;  %v600_v62 = vpop.f32.mrb[7].mxu1 }
 0x1fa   : > { %v2768_v63 = vmul.bf16 3216621497, %v3676_v57  ;;  %v3683_v3 = vpack.c.bf16 %v600_v62, %v596_v53 }
 0x1fb   : > { %v2770_v4 = vmul.bf16 3216621497, %v3678_v60  ;;  %v2769_v5 = vmul.bf16 3216621497, %v3680_v61 }
 0x1fc   : > { %3112 = vpow.bf16 %v2768_v63  ;;  %v2771_v10 = vmul.bf16 3216621497, %v3683_v3 }
 0x1fd   : > { %3114 = vpow.bf16 %v2770_v4 }
 0x1fe   : > { %3116 = vpow.bf16 %v2769_v5 }
 0x1ff   : > { %v3105_v14 = vpop.eup %3104  ;;  %3118 = vpow.bf16 %v2771_v10 }
 0x200   : > { %v3107_v16 = vpop.eup %3106  ;;  %v643_v17 = vadd.bf16 1065369472, %v3105_v14 }
 0x201   : > { %v3109_v18 = vpop.eup %3108  ;;  %v645_v19 = vadd.bf16 1065369472, %v3107_v16 }
 0x202   : > { %v3111_v21 = vpop.eup %3110  ;;  %3120 = vrcp.bf16 %v643_v17  ;;  %v644_v22 = vadd.bf16 1065369472, %v3109_v18 }
 0x203   : > { %3122 = vrcp.bf16 %v645_v19  ;;  %v646_v23 = vadd.bf16 1065369472, %v3111_v21 }
 0x204   : > { %3124 = vrcp.bf16 %v644_v22 }
 0x205   : > { %3126 = vrcp.bf16 %v646_v23 }
 0x207   : > { %v3113_v24 = vpop.eup %3112 }
 0x208   : > { %v3115_v27 = vpop.eup %3114  ;;  %v647_v28 = vadd.bf16 1065369472, %v3113_v24 }
 0x209   : > { %v3117_v30 = vpop.eup %3116  ;;  %v649_v31 = vadd.bf16 1065369472, %v3115_v27  ;;  %v327_v27 = vunpack.c.h.bf16 %v3594_v6 }
 0x20a   : > { %v3119_v34 = vpop.eup %3118  ;;  %3128 = vrcp.bf16 %v647_v28  ;;  %v648_v35 = vadd.bf16 1065369472, %v3117_v30  ;;  %v322_v28 = vunpack.c.l.bf16 %v3589_v2  ;;  %v324_v30 = vunpack.c.h.bf16 %v3587_v1 }
 0x20b   : > { %3130 = vrcp.bf16 %v649_v31  ;;  %v650_v36 = vadd.bf16 1065369472, %v3119_v34  ;;  %v325_v31 = vunpack.c.h.bf16 %v3585_v0  ;;  %v321_v34 = vunpack.c.l.bf16 %v3585_v0 }
 0x20c   : > { %3132 = vrcp.bf16 %v648_v35  ;;  %v332_v1 = vunpack.c.h.bf16 %v3603_v12 }
 0x20d   : > { %v3121_v40 = vpop.eup %3120  ;;  %3134 = vrcp.bf16 %v650_v36  ;;  %v3000_v36 = vpack.i.bf16 %v323_v29, %v322_v28  ;;  %v3010_v6 = vpack.i.bf16 %v321_v34, %v320_v32 }
 0x20e   : > { %v3123_v44 = vpop.eup %3122  ;;  %v652_v46 = vmul.bf16 1065369472, %v3121_v40  ;;  %v330_v40 = vunpack.c.l.bf16 %v3598_v8 }
 0x20f   : > { %v3125_v48 = vpop.eup %3124  ;;  %v656_v49 = vmul.bf16 1065369472, %v3123_v44  ;;  %v3025_v44 = vpack.i.bf16 %v335_v39, %v334_v37 }
 0x210   : > { %v3127_v51 = vpop.eup %3126  ;;  %v667_v52 = vmul.bf16 %v652_v46, %v3662_v38  ;;  %v654_v53 = vmul.bf16 1065369472, %v3125_v48  ;;  %v3020_v0 = vpack.i.bf16 %v331_v43, %v330_v40  ;;  %v333_v46 = vunpack.c.h.bf16 %v3596_v7 }
 0x211   : > { %v669_v58 = vmul.bf16 %v656_v49, %v3664_v41  ;;  %v658_v59 = vmul.bf16 1065369472, %v3127_v51  ;;  %v329_v48 = vunpack.c.l.bf16 %v3596_v7 }
 0x212   : > { %v668_v63 = vmul.bf16 %v654_v53, %v3666_v42  ;;  %v728_v38 = vsel %vm3705_vm10, %v667_v52, 0  ;;  %v3035_v8 = vpack.i.bf16 %v333_v46, %v332_v1  ;;  %v3829_v46 = vadd.s32 4294967286, %v3688_v9 }
 0x213   : > { %v670_v5 = vmul.bf16 %v658_v59, %v3669_v45  ;;  %v730_v10 = vsel %vm3710_vm11, %v669_v58, 0  ;;  %763 = vrot.lane.b32.xlu0 %v728_v38, %s3411_s23  ;;  %v3030_v13 = vpack.i.bf16 %v329_v48, %v328_v47 }
 0x214   : > { %767 = vrot.lane.b32.xlu1 %v730_v10, %s3411_s23  ;;  %2858 = vmatprep.subr.msk.bf16.mxu0 %vm3715_vm12, %v668_v63  ;;  %v729_v45 = vsel %vm3715_vm12, %v668_v63, 0  ;;  %vm1041_vm15 = vcmp.lt.s32.totalorder %v3829_v46, 300 }
 0x215   : > { %v3129_v41 = vpop.eup %3128  ;;  %2860 = vmatprep.subr.msk.bf16.mxu1 %vm3720_vm13, %v670_v5  ;;  %921 = vmatpush1.bf16.msra.mxu0 %v728_v38  ;;  %v731_v24 = vsel %vm3720_vm13, %v670_v5, 0 }
 0x216   : > { %v3131_v42 = vpop.eup %3130  ;;  %v660_v11 = vmul.bf16 1065369472, %v3129_v41  ;;  %974 = vmatpush1.bf16.msra.mxu1 %v730_v10 }
 0x217   : > { %v3133_v14 = vpop.eup %3132  ;;  %v664_v15 = vmul.bf16 1065369472, %v3131_v42  ;;  %765 = vrot.lane.b32.xlu0 %v729_v45, %s3411_s23 }
 0x218   : > { %v3135_v16 = vpop.eup %3134  ;;  %v671_v17 = vmul.bf16 %v660_v11, %v3676_v57  ;;  %v662_v18 = vmul.bf16 1065369472, %v3133_v14  ;;  %797 = vrot.lane.b32.xlu1 %v730_v10, %s3412_s6 }
 0x219   : > { %v673_v19 = vmul.bf16 %v664_v15, %v3678_v60  ;;  %v666_v20 = vmul.bf16 1065369472, %v3135_v16 }
 0x21a   : > { %v672_v21 = vmul.bf16 %v662_v18, %v3680_v61  ;;  %v732_v22 = vsel %vm3705_vm10, %v671_v17, 0 }
 0x21b   : > { %v674_v23 = vmul.bf16 %v666_v20, %v3683_v3  ;;  %795 = vrot.lane.b32.xlu0 %v729_v45, %s3412_s6  ;;  %v734_v57 = vsel %vm3710_vm11, %v673_v19, 0  ;;  %v326_v3 = vunpack.c.h.bf16 %v3589_v2  ;;  %v3015_v2 = vpack.i.bf16 %v325_v31, %v324_v30 }
 0x21c   : > { %769 = vrot.lane.b32.xlu1 %v731_v24, %s3411_s23  ;;  %2859 = vmatprep.subr.msk.bf16.mxu0 %vm3715_vm12, %v672_v21  ;;  %v733_v60 = vsel %vm3715_vm12, %v672_v21, 0 }
 0x21d   : > { %2861 = vmatprep.subr.msk.bf16.mxu1 %vm3720_vm13, %v674_v23  ;;  %923 = vmatpush1.bf16.msra.mxu0 %v732_v22  ;;  %v735_v61 = vsel %vm3720_vm13, %v674_v23, 0  ;;  %v3005_v35 = vpack.i.bf16 %v327_v27, %v326_v3  ;;  %v3063_v23 = vld [vmem:[#allocation7 + $0x8] sm:$0xff]  }
 0x21e   : > { %976 = vmatpush1.bf16.msra.mxu1 %v734_v57 }
 0x21f   : > { %771 = vrot.lane.b32.xlu0 %v732_v22, %s3411_s23 }
 0x220   : > { %775 = vrot.lane.b32.xlu1 %v734_v57, %s3411_s23 }
 0x223   : > { %773 = vrot.lane.b32.xlu0 %v733_v60, %s3411_s23 }
 0x224   : > { %777 = vrot.lane.b32.xlu1 %v735_v61, %s3411_s23 }
 0x227   : > { %793 = vrot.lane.b32.xlu0 %v728_v38, %s3412_s6 }
 0x228   : > { %799 = vrot.lane.b32.xlu1 %v731_v24, %s3412_s6  ;;  %v3416_v24 = vmov 0.0|0.0  }
 0x22b   : > { %803 = vrot.lane.b32.xlu0 %v733_v60, %s3412_s6 }
 0x22c   : > { %805 = vrot.lane.b32.xlu1 %v734_v57, %s3412_s6  ;;  %v2781_v57 = vmul.bf16 3216621497, %v3416_v24 }
 0x22e   : > { %3136 = vpow.bf16 %v2781_v57 }
 0x22f   : > { %801 = vrot.lane.b32.xlu0 %v732_v22, %s3412_s6  ;;  %v3062_v22 = vld [vmem:[#allocation7] sm:$0xff]  }
 0x230   : > { %807 = vrot.lane.b32.xlu1 %v735_v61, %s3412_s6 }
 0x233   : > { %3001 = vrot.lane.b32.xlu0 %v3000_v36, %s3412_s6 }
 0x234   : > { %3006 = vrot.lane.b32.xlu1 %v3005_v35, %s3412_s6 }
 0x237   : > { %3011 = vrot.lane.b32.xlu0 %v3010_v6, %s3412_s6 }
 0x238   : > { %3016 = vrot.lane.b32.xlu1 %v3015_v2, %s3412_s6 }
 0x239   : > { %v3137_v60 = vpop.eup %3136 }
 0x23a   : > { %v1149_v61 = vadd.bf16 1065369472, %v3137_v60 }
 0x23b   : > { %3021 = vrot.lane.b32.xlu0 %v3020_v0, %s3412_s6  ;;  %v3826_v0 = vadd.s32 4294967286, %v3674_v55 }
 0x23c   : > { %3026 = vrot.lane.b32.xlu1 %v3025_v44, %s3412_s6  ;;  %3138 = vrcp.bf16 %v1149_v61 }
 0x23d   : > { %vm1035_vm14 = vcmp.ge.s32.totalorder %v3826_v0, 0 }
 0x23f   : > { %3031 = vrot.lane.b32.xlu0 %v3030_v13, %s3412_s6 }
 0x240   : > { %3036 = vrot.lane.b32.xlu1 %v3035_v8, %s3412_s6 }
 0x247   : > { %v3139_v3 = vpop.eup %3138 }
 0x248   : > { %v1161_v27 = vmul.bf16 1065369472, %v3139_v3 }
 0x24a   : > { %v3817_v28 = vmul.bf16 0.0|0.0, %v1161_v27 }
 0x24c   : > { %1192 = vrot.lane.b32.xlu1 %v3817_v28, %s3417_s7 }
 0x250   : > { %1200 = vrot.lane.b32.xlu1 %v3817_v28, %s3417_s7 }
 0x285   : > { %v764_v49 = vpop.permute.xlu0 %763 }
 0x286   : > { %v768_v50 = vpop.permute.xlu1 %767 }
 0x289   : > { %v766_v51 = vpop.permute.xlu0 %765 }
 0x28a   : > { %v798_v52 = vpop.permute.xlu1 %797  ;;  %v780_v53 = vsel %vm424_vm0, %v766_v51, %v768_v50  ;;  %v779_v12 = vsel %vm424_vm0, %v764_v49, %v766_v51 }
 0x28b   : > { %924 = vmatprep.subr.bf16.mxu0 %v780_v53 }
 0x28c   : > { %925 = vmatpush1.bf16.msra.mxu0 %v779_v12 }
 0x28d   : > { %v796_v7 = vpop.permute.xlu0 %795 }
 0x28e   : > { %v770_v54 = vpop.permute.xlu1 %769  ;;  %v810_v41 = vsel %vm455_vm1, %v796_v7, %v798_v52 }
 0x28f   : > { %977 = vmatprep.subr.bf16.mxu1 %v770_v54  ;;  %v781_v58 = vsel %vm424_vm0, %v768_v50, %v770_v54 }
 0x290   : > { %978 = vmatpush1.bf16.msra.mxu1 %v781_v58 }
 0x291   : > { %v772_v59 = vpop.permute.xlu0 %771 }
 0x292   : > { %v776_v62 = vpop.permute.xlu1 %775 }
 0x295   : > { %v774_v63 = vpop.permute.xlu0 %773 }
 0x296   : > { %v778_v4 = vpop.permute.xlu1 %777  ;;  %v783_v38 = vsel %vm424_vm0, %v774_v63, %v776_v62  ;;  %v782_v5 = vsel %vm424_vm0, %v772_v59, %v774_v63 }
 0x297   : > { %979 = vmatprep.subr.bf16.mxu1 %v778_v4  ;;  %926 = vmatprep.subr.bf16.mxu0 %v783_v38  ;;  %v784_v10 = vsel %vm424_vm0, %v776_v62, %v778_v4 }
 0x298   : > { %980 = vmatpush1.bf16.msra.mxu1 %v784_v10  ;;  %927 = vmatpush1.bf16.msra.mxu0 %v782_v5 }
 0x299   : > { %928 = vmatprep.subr.bf16.mxu0 %v810_v41  ;;  %v794_v42 = vpop.permute.xlu0 %793 }
 0x29a   : > { %v800_v11 = vpop.permute.xlu1 %799  ;;  %v809_v45 = vsel %vm455_vm1, %v794_v42, %v796_v7 }
 0x29b   : > { %981 = vmatprep.subr.bf16.mxu1 %v800_v11  ;;  %v811_v14 = vsel %vm455_vm1, %v798_v52, %v800_v11 }
 0x29c   : > { %982 = vmatpush1.bf16.msra.mxu1 %v811_v14  ;;  %929 = vmatpush1.bf16.msra.mxu0 %v809_v45 }
 0x29d   : > { %v804_v15 = vpop.permute.xlu0 %803 }
 0x29e   : > { %v806_v16 = vpop.permute.xlu1 %805 }
 0x29f   : > { %v813_v17 = vsel %vm455_vm1, %v804_v15, %v806_v16 }
 0x2a0   : > { %930 = vmatprep.subr.bf16.mxu0 %v813_v17 }
 0x2a1   : > { %v802_v18 = vpop.permute.xlu0 %801 }
 0x2a2   : > { %v808_v19 = vpop.permute.xlu1 %807  ;;  %v812_v20 = vsel %vm455_vm1, %v802_v18, %v804_v15 }
 0x2a3   : > { %983 = vmatprep.subr.bf16.mxu1 %v808_v19  ;;  %931 = vmatpush1.bf16.msra.mxu0 %v812_v20  ;;  %v814_v21 = vsel %vm455_vm1, %v806_v16, %v808_v19 }
 0x2a4   : > { %984 = vmatpush1.bf16.msra.mxu1 %v814_v21  ;;  %932 = vmatprep.subr.bf16.mxu0 %v3646_v26 }
 0x2a5   : > { %985 = vmatprep.subr.bf16.mxu1 %v3646_v26  ;;  %v3002_v29 = vpop.permute.xlu0 %3001 }
 0x2a6   : > { %v3007_v30 = vpop.permute.xlu1 %3006  ;;  %v3004_v39 = vunpack.i.h.bf16 %v3002_v29  ;;  %v3003_v2 = vunpack.i.l.bf16 %v3002_v29 }
 0x2a7   : > { %933 = vmatpush1.bf16.msra.mxu0 %v3646_v26  ;;  %v3009_v6 = vunpack.i.h.bf16 %v3007_v30  ;;  %v3008_v40 = vunpack.i.l.bf16 %v3007_v30 }
 0x2a8   : > { %986 = vmatpush1.bf16.msra.mxu1 %v3646_v26  ;;  %v888_v48 = vsel %vm455_vm1, %v3003_v2, %v3004_v39 }
 0x2a9   : > { %1322 = vmatprep.subr.bf16.mxu1 %v3817_v28  ;;  %v3012_v31 = vpop.permute.xlu0 %3011  ;;  %v891_v50 = vsel %vm455_vm1, %v3008_v40, %v3009_v6 }
 0x2aa   : > { %2774 = vmatmul.mubr.msk.bf16.vlgmr.msra.gmra.mrb[8].mxu0 %vm484_vm3, %v3062_v22  ;;  %v3017_v32 = vpop.permute.xlu1 %3016  ;;  %v3014_v35 = vunpack.i.h.bf16 %v3012_v31  ;;  %v3013_v36 = vunpack.i.l.bf16 %v3012_v31 }
 0x2ab   : > { %2776 = vmatmul.mubr.msk.bf16.vlgmr.msra.gmra.mrb[8].mxu1 %vm484_vm3, %v3062_v22  ;;  %962 = vmatprep.mubr.bf16.mxu0 %v3413_v56  ;;  %v3018_v43 = vunpack.i.l.bf16 %v3017_v32  ;;  %v3019_v44 = vunpack.i.h.bf16 %v3017_v32 }
 0x2ac   : > { %1015 = vmatprep.mubr.bf16.mxu1 %v3413_v56  ;;  %v886_v1 = vsel %vm455_vm1, %v3013_v36, %v3014_v35  ;;  %v887_v13 = vsel %vm455_vm1, %v3014_v35, %v3003_v2 }
 0x2ad   : > { %v3022_v34 = vpop.permute.xlu0 %3021  ;;  %v889_v49 = vsel %vm455_vm1, %v3018_v43, %v3019_v44  ;;  %v890_v7 = vsel %vm455_vm1, %v3019_v44, %v3008_v40 }
 0x2ae   : > { %v3027_v37 = vpop.permute.xlu1 %3026  ;;  %v3024_v41 = vunpack.i.h.bf16 %v3022_v34  ;;  %v3023_v42 = vunpack.i.l.bf16 %v3022_v34 }
 0x2af   : > { %v3029_v4 = vunpack.i.h.bf16 %v3027_v37  ;;  %v3028_v20 = vunpack.i.l.bf16 %v3027_v37 }
 0x2b0   : > { %v894_v61 = vsel %vm455_vm1, %v3023_v42, %v3024_v41 }
 0x2b1   : > { %v3032_v47 = vpop.permute.xlu0 %3031  ;;  %v897_v37 = vsel %vm455_vm1, %v3028_v20, %v3029_v4 }
 0x2b2   : > { %2775 = vmatmul.mubr.msk.bf16.gmra.mrb[12].mxu0 %vm484_vm3, %v3063_v23  ;;  %v3037_v51 = vpop.permute.xlu1 %3036  ;;  %v3034_v54 = vunpack.i.h.bf16 %v3032_v47  ;;  %v3033_v58 = vunpack.i.l.bf16 %v3032_v47 }
 0x2b3   : > { %2777 = vmatmul.mubr.msk.bf16.gmra.mrb[12].mxu1 %vm484_vm3, %v3063_v23  ;;  %1301 = vmatprep.mubr.bf16.mxu0 %v3413_v56  ;;  %v3039_v11 = vunpack.i.h.bf16 %v3037_v51  ;;  %v3038_v17 = vunpack.i.l.bf16 %v3037_v51 }
 0x2b4   : > { %1354 = vmatprep.mubr.bf16.mxu1 %v3413_v56  ;;  %v892_v21 = vsel %vm455_vm1, %v3033_v58, %v3034_v54  ;;  %v893_v3 = vsel %vm455_vm1, %v3034_v54, %v3023_v42 }
 0x2b5   : > { %v895_v31 = vsel %vm455_vm1, %v3038_v17, %v3039_v11  ;;  %v896_v39 = vsel %vm455_vm1, %v3039_v11, %v3028_v20 }
 0x37d   : > { %v954_v8 = vpop.f32.mrb[8].mxu0 }
 0x37e   : > { %v955_v52 = vadd.f32 %v954_v8, %v886_v1  ;;  %v1007_v53 = vpop.f32.mrb[8].mxu1  ;;  %v956_v12 = vpop.f32.mrb[9].mxu0 }
 0x37f   : > { %v1008_v59 = vadd.f32 %v1007_v53, %v888_v48  ;;  %v1009_v62 = vpop.f32.mrb[9].mxu1  ;;  %v958_v63 = vpop.f32.mrb[10].mxu0  ;;  %v3838_v45 = vadd.f32 %v956_v12, %v887_v13 }
 0x380   : > { %v959_v38 = vadd.f32 %v958_v63, %v889_v49  ;;  %v1011_v5 = vpop.f32.mrb[10].mxu1  ;;  %v960_v10 = vpop.f32.mrb[11].mxu0  ;;  %v3844_v18 = vsel %vm1035_vm14, %v955_v52, 0.0 }
 0x381   : > { %v1012_v14 = vadd.f32 %v1011_v5, %v891_v50  ;;  %v3840_v15 = vadd.f32 %v960_v10, %v890_v7  ;;  %v1013_v16 = vpop.f32.mrb[11].mxu1  ;;  %v3853_v22 = vsel %vm1041_vm15, %v1008_v59, 0.0 }
 0x382   : > { %v3848_v19 = vsel %vm1035_vm14, %v959_v38, 0.0 }
 0x383   : > { %v3857_v23 = vpack.c.bf16 %v3848_v19, %v3844_v18  ;;  %v3861_v24 = vsel %vm1041_vm15, %v1012_v14, 0.0  ;;  %v3865_v57 = vpack.c.bf16 %v3840_v15, %v3838_v45 }
 0x384   : > { %v3869_v60 = vpack.c.bf16 %v3861_v24, %v3853_v22 }
 0x385   : > { %v2778_v27 = vmul.bf16 3216621497, %v3857_v23  ;;  %v2779_v29 = vmul.bf16 3216621497, %v3865_v57  ;;  %v964_v30 = vpop.f32.mrb[12].mxu0 }
 0x386   : > { %v2780_v32 = vmul.bf16 3216621497, %v3869_v60  ;;  %v965_v34 = vadd.f32 %v964_v30, %v892_v21  ;;  %v1017_v35 = vpop.f32.mrb[12].mxu1  ;;  %v966_v36 = vpop.f32.mrb[13].mxu0 }
 0x387   : > { %3140 = vpow.bf16 %v2778_v27  ;;  %v1018_v2 = vadd.f32 %v1017_v35, %v894_v61  ;;  %v3879_v6 = vadd.f32 %v966_v36, %v893_v3  ;;  %v1019_v40 = vpop.f32.mrb[13].mxu1  ;;  %v968_v43 = vpop.f32.mrb[14].mxu0 }
 0x388   : > { %3142 = vpow.bf16 %v2780_v32  ;;  %v3883_v44 = vsel %vm1035_vm14, %v965_v34, 0.0  ;;  %v969_v1 = vadd.f32 %v968_v43, %v895_v31  ;;  %v1021_v47 = vpop.f32.mrb[14].mxu1  ;;  %v970_v48 = vpop.f32.mrb[15].mxu0 }
 0x389   : > { %3144 = vpow.bf16 %v2779_v29  ;;  %v3887_v8 = vsel %vm1041_vm15, %v1018_v2, 0.0  ;;  %v1022_v13 = vadd.f32 %v1021_v47, %v897_v37  ;;  %v3889_v49 = vadd.f32 %v970_v48, %v896_v39  ;;  %v1023_v50 = vpop.f32.mrb[15].mxu1  ;;  %v1193_v39 = vpop.permute.xlu1 %1192 }
 0x38a   : > { %v3893_v51 = vsel %vm1035_vm14, %v969_v1, 0.0 }
 0x38b   : > { %v1110_v52 = vpack.c.bf16 %v3893_v51, %v3883_v44  ;;  %v3899_v53 = vsel %vm1041_vm15, %v1022_v13, 0.0  ;;  %v1111_v12 = vpack.c.bf16 %v3889_v49, %v3879_v6  ;;  %vm1658_vm15 = vcmask 1014784  }
 0x38c   : > { %v1112_v7 = vpack.c.bf16 %v3899_v53, %v3887_v8 }
 0x38d   : > { %v2782_v54 = vmul.bf16 3216621497, %v1110_v52  ;;  %v2783_v58 = vmul.bf16 3216621497, %v1111_v12  ;;  %v1201_v2 = vpop.permute.xlu1 %1200 }
 0x38e   : > { %v2784_v59 = vmul.bf16 3216621497, %v1112_v7 }
 0x38f   : > { %3146 = vpow.bf16 %v2782_v54 }
 0x390   : > { %3148 = vpow.bf16 %v2784_v59 }
 0x391   : > { %3150 = vpow.bf16 %v2783_v58 }
 0x392   : > { %v3141_v0 = vpop.eup %3140 }
 0x393   : > { %v3143_v62 = vpop.eup %3142  ;;  %v1146_v63 = vadd.bf16 1065369472, %v3141_v0 }
 0x394   : > { %v3145_v4 = vpop.eup %3144  ;;  %v1148_v38 = vadd.bf16 1065369472, %v3143_v62 }
 0x395   : > { %3152 = vrcp.bf16 %v1146_v63  ;;  %v1147_v46 = vadd.bf16 1065369472, %v3145_v4 }
 0x396   : > { %3154 = vrcp.bf16 %v1148_v38 }
 0x397   : > { %3156 = vrcp.bf16 %v1147_v46 }
 0x39a   : > { %v3147_v5 = vpop.eup %3146 }
 0x39b   : > { %v3149_v10 = vpop.eup %3148  ;;  %v1150_v41 = vadd.bf16 1065369472, %v3147_v5 }
 0x39c   : > { %v3151_v42 = vpop.eup %3150  ;;  %v1152_v11 = vadd.bf16 1065369472, %v3149_v10 }
 0x39d   : > { %3158 = vrcp.bf16 %v1150_v41  ;;  %v1151_v14 = vadd.bf16 1065369472, %v3151_v42  ;;  %v3064_v42 = vld [vmem:[#allocation4 + $0x10] sm:$0xff]  }
 0x39e   : > { %3160 = vrcp.bf16 %v1152_v11 }
 0x39f   : > { %3162 = vrcp.bf16 %v1151_v14 }
 0x3a0   : > { %v3153_v16 = vpop.eup %3152 }
 0x3a1   : > { %v3155_v17 = vpop.eup %3154  ;;  %v1155_v20 = vmul.bf16 1065369472, %v3153_v16 }
 0x3a2   : > { %v3157_v21 = vpop.eup %3156  ;;  %v1159_v61 = vmul.bf16 1065369472, %v3155_v17 }
 0x3a3   : > { %v1157_v3 = vmul.bf16 1065369472, %v3157_v21  ;;  %v1170_v27 = vmul.bf16 %v1155_v20, %v3857_v23  ;;  %v3065_v20 = vld [vmem:[#allocation4 + $0x18] sm:$0xff]  }
 0x3a4   : > { %v1172_v29 = vmul.bf16 %v1159_v61, %v3869_v60 }
 0x3a5   : > { %v1171_v30 = vmul.bf16 %v1157_v3, %v3865_v57 }
 0x3a6   : > { %1323 = vmatpush1.bf16.msra.mxu1 %v1172_v29  ;;  %1190 = vrot.lane.b32.xlu1 %v1172_v29, %s3417_s7 }
 0x3a7   : > { %1188 = vrot.lane.b32.xlu0 %v1171_v30, %s3417_s7  ;;  %1269 = vmatprep.subr.bf16.mxu0 %v1171_v30 }
 0x3a8   : > { %v3159_v31 = vpop.eup %3158  ;;  %1270 = vmatpush1.bf16.msra.mxu0 %v1170_v27  ;;  %1324 = vmatprep.subr.bf16.mxu1 %v3817_v28 }
 0x3a9   : > { %v3161_v32 = vpop.eup %3160  ;;  %v1163_v34 = vmul.bf16 1065369472, %v3159_v31 }
 0x3aa   : > { %v3163_v35 = vpop.eup %3162  ;;  %1221 = vrot.lane.b32.xlu1 %v1172_v29, %s3418_s8  ;;  %v1167_v23 = vmul.bf16 1065369472, %v3161_v32 }
 0x3ab   : > { %1186 = vrot.lane.b32.xlu0 %v1170_v27, %s3417_s7  ;;  %v1165_v57 = vmul.bf16 1065369472, %v3163_v35  ;;  %v1174_v60 = vmul.bf16 %v1163_v34, %v1110_v52 }
 0x3ac   : > { %v1176_v36 = vmul.bf16 %v1167_v23, %v1112_v7 }
 0x3ad   : > { %v1175_v37 = vmul.bf16 %v1165_v57, %v1111_v12 }
 0x3ae   : > { %1198 = vrot.lane.b32.xlu1 %v1176_v36, %s3417_s7  ;;  %1325 = vmatpush1.bf16.msra.mxu1 %v1176_v36 }
 0x3af   : > { %1219 = vrot.lane.b32.xlu0 %v1171_v30, %s3418_s8  ;;  %1271 = vmatprep.subr.bf16.mxu0 %v1175_v37 }
 0x3b0   : > { %1272 = vmatpush1.bf16.msra.mxu0 %v1174_v60  ;;  %1326 = vmatprep.subr.bf16.mxu1 %v1193_v39 }
 0x3b2   : > { %1223 = vrot.lane.b32.xlu1 %v3817_v28, %s3418_s8 }
 0x3b3   : > { %1217 = vrot.lane.b32.xlu0 %v1170_v27, %s3418_s8 }
 0x3b6   : > { %1229 = vrot.lane.b32.xlu1 %v1176_v36, %s3418_s8 }
 0x3b7   : > { %1196 = vrot.lane.b32.xlu0 %v1175_v37, %s3417_s7 }
 0x3ba   : > { %1231 = vrot.lane.b32.xlu1 %v3817_v28, %s3418_s8 }
 0x3bb   : > { %1194 = vrot.lane.b32.xlu0 %v1174_v60, %s3417_s7 }
 0x3bf   : > { %1227 = vrot.lane.b32.xlu0 %v1175_v37, %s3418_s8 }
 0x3c3   : > { %1225 = vrot.lane.b32.xlu0 %v1174_v60, %s3418_s8 }
 0x418   : > { %v1191_v40 = vpop.permute.xlu1 %1190 }
 0x419   : > { %v1205_v43 = vsel %vm1202_vm2, %v1191_v40, %v1193_v39  ;;  %v1189_v1 = vpop.permute.xlu0 %1188 }
 0x41a   : > { %v1204_v47 = vsel %vm1202_vm2, %v1189_v1, %v1191_v40  ;;  %1327 = vmatpush1.bf16.msra.mxu1 %v1205_v43 }
 0x41b   : > { %1273 = vmatprep.subr.bf16.mxu0 %v1204_v47  ;;  %1328 = vmatprep.subr.bf16.mxu1 %v1201_v2 }
 0x41c   : > { %v1222_v48 = vpop.permute.xlu1 %1221 }
 0x41d   : > { %v1187_v13 = vpop.permute.xlu0 %1186 }
 0x41e   : > { %v1203_v50 = vsel %vm1202_vm2, %v1187_v13, %v1189_v1 }
 0x41f   : > { %1274 = vmatpush1.bf16.msra.mxu0 %v1203_v50 }
 0x420   : > { %v1199_v52 = vpop.permute.xlu1 %1198 }
 0x421   : > { %v1208_v12 = vsel %vm1202_vm2, %v1199_v52, %v1201_v2  ;;  %v1220_v7 = vpop.permute.xlu0 %1219 }
 0x422   : > { %1329 = vmatpush1.bf16.msra.mxu1 %v1208_v12  ;;  %v1235_v10 = vsel %vm1233_vm4, %v1220_v7, %v1222_v48  ;;  %v1454_v12 = vadd.s32 4294967289, %v3688_v9 }
 0x424   : > { %v1224_v54 = vpop.permute.xlu1 %1223  ;;  %vm1462_vm5 = vcmp.lt.s32.totalorder %v1454_v12, 300 }
 0x425   : > { %v1236_v58 = vsel %vm1233_vm4, %v1222_v48, %v1224_v54  ;;  %v1218_v59 = vpop.permute.xlu0 %1217  ;;  %1330 = vmatprep.subr.bf16.mxu1 %v1224_v54  ;;  %vm1477_vm7 = vmpackc.low %vm3415_vm8, %vm1462_vm5 }
 0x426   : > { %1331 = vmatpush1.bf16.msra.mxu1 %v1236_v58  ;;  %v1234_v11 = vsel %vm1233_vm4, %v1218_v59, %v1220_v7 }
 0x428   : > { %v1230_v0 = vpop.permute.xlu1 %1229 }
 0x429   : > { %v1197_v62 = vpop.permute.xlu0 %1196 }
 0x42a   : > { %v1207_v63 = vsel %vm1202_vm2, %v1197_v62, %v1199_v52 }
 0x42b   : > { %1275 = vmatprep.subr.bf16.mxu0 %v1207_v63 }
 0x42c   : > { %v1232_v4 = vpop.permute.xlu1 %1231 }
 0x42d   : > { %v1239_v38 = vsel %vm1233_vm4, %v1230_v0, %v1232_v4  ;;  %v1195_v46 = vpop.permute.xlu0 %1194  ;;  %1332 = vmatprep.subr.bf16.mxu1 %v1232_v4 }
 0x42e   : > { %v1206_v5 = vsel %vm1202_vm2, %v1195_v46, %v1197_v62  ;;  %1333 = vmatpush1.bf16.msra.mxu1 %v1239_v38 }
 0x42f   : > { %1276 = vmatpush1.bf16.msra.mxu0 %v1206_v5  ;;  %1334 = vmatprep.subr.bf16.mxu1 %v3646_v26 }
 0x430   : > { %1277 = vmatprep.subr.bf16.mxu0 %v1235_v10 }
 0x431   : > { %v1228_v41 = vpop.permute.xlu0 %1227 }
 0x432   : > { %1335 = vmatpush1.bf16.msra.mxu1 %v3646_v26  ;;  %v1238_v14 = vsel %vm1233_vm4, %v1228_v41, %v1230_v0 }
 0x433   : > { %1278 = vmatpush1.bf16.msra.mxu0 %v1234_v11 }
 0x434   : > { %1279 = vmatprep.subr.bf16.mxu0 %v1238_v14  ;;  %v1479_v14 = vsel %vm1477_vm7, 65537, %v3413_v56  ;;  %vm1975_vm7 = vcmask 1006592  }
 0x435   : > { %v1226_v16 = vpop.permute.xlu0 %1225  ;;  %2790 = vmatmul.mubr.msk.bf16.vlgmr.msra.gmra.mrb[16].mxu1 %vm484_vm3, %v3064_v42 }
 0x436   : > { %v1237_v17 = vsel %vm1233_vm4, %v1226_v16, %v1228_v41  ;;  %1364 = vmatprep.mubr.bf16.mxu1 %v3413_v56  ;;  %v1452_v41 = vadd.s32 4294967289, %v3674_v55 }
 0x437   : > { %1280 = vmatpush1.bf16.msra.mxu0 %v1237_v17 }
 0x438   : > { %1281 = vmatprep.subr.bf16.mxu0 %v3646_v26  ;;  %vm1456_vm9 = vcmp.ge.s32.totalorder %v1452_v41, 0 }
 0x439   : > { %vm1476_vm10 = vmpackc.low %vm3414_vm6, %vm1456_vm9  ;;  %vm2006_vm9 = vcmask 965632  }
 0x43b   : > { %1282 = vmatpush1.bf16.msra.mxu0 %v3646_v26 }
 0x43d   : > { %2791 = vmatmul.mubr.msk.bf16.gmra.mrb[20].mxu1 %vm484_vm3, %v3065_v20 }
 0x43e   : > { %2788 = vmatmul.mubr.msk.bf16.vlgmr.msra.gmra.mrb[16].mxu0 %vm484_vm3, %v3064_v42  ;;  %1778 = vmatprep.mubr.bf16.mxu1 %v3413_v56 }
 0x43f   : > { %1311 = vmatprep.mubr.bf16.mxu0 %v3413_v56 }
 0x446   : > { %2789 = vmatmul.mubr.msk.bf16.gmra.mrb[20].mxu0 %vm484_vm3, %v3065_v20 }
 0x447   : > { %1725 = vmatprep.mubr.bf16.mxu0 %v3413_v56 }
 0x508   : > { %v1356_v21 = vpop.f32.mrb[16].mxu1 }
 0x509   : > { %v1358_v61 = vpop.f32.mrb[17].mxu1 }
 0x50a   : > { %v1360_v3 = vpop.f32.mrb[18].mxu1 }
 0x50b   : > { %v3949_v27 = vpack.c.bf16 %v1360_v3, %v1356_v21  ;;  %v1362_v29 = vpop.f32.mrb[19].mxu1  ;;  %v1491_v3 = vrot.slane %v1479_v14, %v3695_v25 }
 0x50c   : > { %v3951_v30 = vpack.c.bf16 %v1362_v29, %v1358_v61  ;;  %v1495_v29 = vrot.slane %v1479_v14, %v3699_v33 }
 0x50d   : > { %v2794_v31 = vmul.bf16 3216621497, %v3949_v27  ;;  %vm3980_vm11 = vcmp.ne.s16.totalorder %v1491_v3, 0 }
 0x50e   : > { %v2795_v32 = vmul.bf16 3216621497, %v3951_v30  ;;  %vm3985_vm12 = vcmp.ne.s16.totalorder %v1495_v29, 0 }
 0x50f   : > { %3164 = vpow.bf16 %v2794_v31 }
 0x510   : > { %3166 = vpow.bf16 %v2795_v32  ;;  %v1366_v34 = vpop.f32.mrb[20].mxu1 }
 0x511   : > { %v1303_v35 = vpop.f32.mrb[16].mxu0  ;;  %v1368_v23 = vpop.f32.mrb[21].mxu1 }
 0x512   : > { %v1305_v57 = vpop.f32.mrb[17].mxu0  ;;  %v1370_v60 = vpop.f32.mrb[22].mxu1 }
 0x513   : > { %v1307_v36 = vpop.f32.mrb[18].mxu0  ;;  %v3955_v37 = vpack.c.bf16 %v1370_v60, %v1366_v34  ;;  %v1372_v39 = vpop.f32.mrb[23].mxu1 }
 0x514   : > { %v3957_v2 = vpack.c.bf16 %v1307_v36, %v1303_v35  ;;  %v1309_v40 = vpop.f32.mrb[19].mxu0  ;;  %v3959_v43 = vpack.c.bf16 %v1372_v39, %v1368_v23 }
 0x515   : > { %v2798_v1 = vmul.bf16 3216621497, %v3955_v37  ;;  %v3962_v47 = vpack.c.bf16 %v1309_v40, %v1305_v57 }
 0x516   : > { %v2792_v48 = vmul.bf16 3216621497, %v3957_v2  ;;  %v2799_v13 = vmul.bf16 3216621497, %v3959_v43 }
 0x517   : > { %3168 = vpow.bf16 %v2798_v1  ;;  %v2793_v50 = vmul.bf16 3216621497, %v3962_v47 }
 0x518   : > { %3170 = vpow.bf16 %v2792_v48  ;;  %v1478_v48 = vsel %vm1476_vm10, 65537, %v3413_v56 }
 0x519   : > { %3172 = vpow.bf16 %v2793_v50  ;;  %v1313_v52 = vpop.f32.mrb[20].mxu0 }
 0x51a   : > { %v3165_v7 = vpop.eup %3164  ;;  %3174 = vpow.bf16 %v2799_v13  ;;  %v1315_v54 = vpop.f32.mrb[21].mxu0 }
 0x51b   : > { %v3167_v58 = vpop.eup %3166  ;;  %v1417_v59 = vadd.bf16 1065369472, %v3165_v7  ;;  %v1317_v0 = vpop.f32.mrb[22].mxu0 }
 0x51c   : > { %v1418_v62 = vadd.bf16 1065369472, %v3167_v58  ;;  %v3968_v63 = vpack.c.bf16 %v1317_v0, %v1313_v52  ;;  %v1319_v4 = vpop.f32.mrb[23].mxu0 }
 0x51d   : > { %3176 = vrcp.bf16 %v1417_v59  ;;  %v3970_v38 = vpack.c.bf16 %v1319_v4, %v1315_v54 }
 0x51e   : > { %3178 = vrcp.bf16 %v1418_v62  ;;  %v2796_v46 = vmul.bf16 3216621497, %v3968_v63 }
 0x51f   : > { %v2797_v5 = vmul.bf16 3216621497, %v3970_v38 }
 0x520   : > { %3180 = vpow.bf16 %v2796_v46 }
 0x521   : > { %3182 = vpow.bf16 %v2797_v5 }
 0x522   : > { %v3169_v10 = vpop.eup %3168 }
 0x523   : > { %v3171_v42 = vpop.eup %3170  ;;  %v1421_v11 = vadd.bf16 1065369472, %v3169_v10  ;;  %v1806_v10 = vadd.s32 4294967290, %v3688_v9 }
 0x524   : > { %v3173_v16 = vpop.eup %3172  ;;  %v1415_v17 = vadd.bf16 1065369472, %v3171_v42 }
 0x525   : > { %v3175_v20 = vpop.eup %3174  ;;  %3184 = vrcp.bf16 %v1421_v11  ;;  %v1416_v21 = vadd.bf16 1065369472, %v3173_v16  ;;  %vm1814_vm2 = vcmp.lt.s32.totalorder %v1806_v10, 300 }
 0x526   : > { %3186 = vrcp.bf16 %v1415_v17  ;;  %v1422_v61 = vadd.bf16 1065369472, %v3175_v20 }
 0x527   : > { %3188 = vrcp.bf16 %v1416_v21 }
 0x528   : > { %v3177_v31 = vpop.eup %3176  ;;  %3190 = vrcp.bf16 %v1422_v61 }
 0x529   : > { %v3179_v32 = vpop.eup %3178  ;;  %v1428_v34 = vmul.bf16 1065369472, %v3177_v31 }
 0x52a   : > { %v1430_v35 = vmul.bf16 1065369472, %v3179_v32 }
 0x52b   : > { %v3181_v57 = vpop.eup %3180  ;;  %v1441_v60 = vmul.bf16 %v1428_v34, %v3949_v27  ;;  %v1483_v27 = vrot.slane %v1478_v48, %v3695_v25 }
 0x52c   : > { %v3183_v39 = vpop.eup %3182  ;;  %v1442_v40 = vmul.bf16 %v1430_v35, %v3951_v30  ;;  %v1419_v1 = vadd.bf16 1065369472, %v3181_v57  ;;  %v1487_v30 = vrot.slane %v1478_v48, %v3699_v33 }
 0x52d   : > { %v1420_v13 = vadd.bf16 1065369472, %v3183_v39  ;;  %v1502_v50 = vsel %vm3980_vm11, %v1441_v60, 0  ;;  %vm4000_vm13 = vcmp.ne.s16.totalorder %v1483_v27, 0 }
 0x52e   : > { %3192 = vrcp.bf16 %v1419_v1  ;;  %1539 = vrot.lane.b32.xlu1 %v1502_v50, %s3411_s23  ;;  %2864 = vmatprep.subr.msk.bf16.mxu1 %vm3985_vm12, %v1442_v40  ;;  %vm4005_vm14 = vcmp.ne.s16.totalorder %v1487_v30, 0  ;;  %v1503_v42 = vsel %vm3985_vm12, %v1442_v40, 0  ;;  %v3067_v30 = vld [vmem:[#allocation7 + $0x18] sm:$0xff]  }
 0x52f   : > { %3194 = vrcp.bf16 %v1420_v13  ;;  %1747 = vmatpush1.bf16.msra.mxu1 %v1502_v50  ;;  %v3066_v13 = vld [vmem:[#allocation7 + $0x10] sm:$0xff]  }
 0x530   : > { %v3185_v52 = vpop.eup %3184 }
 0x531   : > { %v3187_v12 = vpop.eup %3186  ;;  %v1436_v7 = vmul.bf16 1065369472, %v3185_v52 }
 0x532   : > { %v3189_v54 = vpop.eup %3188  ;;  %v1424_v58 = vmul.bf16 1065369472, %v3187_v12  ;;  %1569 = vrot.lane.b32.xlu1 %v1502_v50, %s3412_s6 }
 0x533   : > { %v3191_v59 = vpop.eup %3190  ;;  %v1445_v0 = vmul.bf16 %v1436_v7, %v3955_v37  ;;  %v1426_v62 = vmul.bf16 1065369472, %v3189_v54 }
 0x534   : > { %v1439_v46 = vmul.bf16 %v1424_v58, %v3957_v2  ;;  %v1438_v5 = vmul.bf16 1065369472, %v3191_v59 }
 0x535   : > { %v1440_v41 = vmul.bf16 %v1426_v62, %v3962_v47  ;;  %v1506_v2 = vsel %vm3980_vm11, %v1445_v0, 0 }
 0x536   : > { %v1446_v11 = vmul.bf16 %v1438_v5, %v3959_v43  ;;  %1541 = vrot.lane.b32.xlu1 %v1503_v42, %s3411_s23  ;;  %v1500_v37 = vsel %vm4000_vm13, %v1439_v46, 0 }
 0x537   : > { %1535 = vrot.lane.b32.xlu0 %v1500_v37, %s3411_s23  ;;  %2862 = vmatprep.subr.msk.bf16.mxu0 %vm4005_vm14, %v1440_v41  ;;  %v1501_v16 = vsel %vm4005_vm14, %v1440_v41, 0 }
 0x538   : > { %2865 = vmatprep.subr.msk.bf16.mxu1 %vm3985_vm12, %v1446_v11  ;;  %1694 = vmatpush1.bf16.msra.mxu0 %v1500_v37  ;;  %v1507_v61 = vsel %vm3985_vm12, %v1446_v11, 0 }
 0x539   : > { %v3193_v47 = vpop.eup %3192  ;;  %1749 = vmatpush1.bf16.msra.mxu1 %v1506_v2 }
 0x53a   : > { %v3195_v43 = vpop.eup %3194  ;;  %v1432_v14 = vmul.bf16 1065369472, %v3193_v47  ;;  %1547 = vrot.lane.b32.xlu1 %v1506_v2, %s3411_s23 }
 0x53b   : > { %v1434_v17 = vmul.bf16 1065369472, %v3195_v43  ;;  %1537 = vrot.lane.b32.xlu0 %v1501_v16, %s3411_s23 }
 0x53c   : > { %v1443_v20 = vmul.bf16 %v1432_v14, %v3968_v63 }
 0x53d   : > { %v1444_v21 = vmul.bf16 %v1434_v17, %v3970_v38  ;;  %v3419_v38 = vmov 0.0  }
 0x53e   : > { %1549 = vrot.lane.b32.xlu1 %v1507_v61, %s3411_s23  ;;  %v1504_v3 = vsel %vm4000_vm13, %v1443_v20, 0 }
 0x53f   : > { %1567 = vrot.lane.b32.xlu0 %v1501_v16, %s3412_s6  ;;  %2863 = vmatprep.subr.msk.bf16.mxu0 %vm4005_vm14, %v1444_v21  ;;  %v1505_v63 = vsel %vm4005_vm14, %v1444_v21, 0 }
 0x540   : > { %1696 = vmatpush1.bf16.msra.mxu0 %v1504_v3 }
 0x542   : > { %1571 = vrot.lane.b32.xlu1 %v1503_v42, %s3412_s6 }
 0x543   : > { %1543 = vrot.lane.b32.xlu0 %v1504_v3, %s3411_s23 }
 0x546   : > { %1577 = vrot.lane.b32.xlu1 %v1506_v2, %s3412_s6 }
 0x547   : > { %1545 = vrot.lane.b32.xlu0 %v1505_v63, %s3411_s23 }
 0x54a   : > { %1579 = vrot.lane.b32.xlu1 %v1507_v61, %s3412_s6 }
 0x54b   : > { %1565 = vrot.lane.b32.xlu0 %v1500_v37, %s3412_s6 }
 0x54e   : > { %3041 = vrot.lane.b32.xlu1 %v3419_v38, %s3420_s9 }
 0x54f   : > { %1575 = vrot.lane.b32.xlu0 %v1505_v63, %s3412_s6 }
 0x552   : > { %1626 = vrot.lane.b32.xlu1 %v3844_v18, %s3420_s9 }
 0x553   : > { %1573 = vrot.lane.b32.xlu0 %v1504_v3, %s3412_s6 }
 0x556   : > { %1634 = vrot.lane.b32.xlu1 %v3848_v19, %s3420_s9 }
 0x557   : > { %1630 = vrot.lane.b32.xlu0 %v3853_v22, %s3420_s9 }
 0x55a   : > { %1646 = vrot.lane.b32.xlu1 %v3887_v8, %s3420_s9 }
 0x55b   : > { %1638 = vrot.lane.b32.xlu0 %v3861_v24, %s3420_s9 }
 0x55e   : > { %1654 = vrot.lane.b32.xlu1 %v3899_v53, %s3420_s9 }
 0x55f   : > { %1628 = vrot.lane.b32.xlu0 %v3838_v45, %s3420_s9 }
 0x562   : > { %1644 = vrot.lane.b32.xlu1 %v3879_v6, %s3420_s9 }
 0x563   : > { %1636 = vrot.lane.b32.xlu0 %v3840_v15, %s3420_s9 }
 0x566   : > { %1652 = vrot.lane.b32.xlu1 %v3889_v49, %s3420_s9 }
 0x567   : > { %3046 = vrot.lane.b32.xlu0 %v3419_v38, %s3420_s9 }
 0x56a   : > { %1965 = vrot.lane.b32.xlu1 %v3817_v28, %s3421_s10 }
 0x56b   : > { %1642 = vrot.lane.b32.xlu0 %v3883_v44, %s3420_s9 }
 0x56e   : > { %1973 = vrot.lane.b32.xlu1 %v3817_v28, %s3421_s10 }
 0x56f   : > { %1650 = vrot.lane.b32.xlu0 %v3893_v51, %s3420_s9 }
 0x5a0   : > { %v1540_v18 = vpop.permute.xlu1 %1539 }
 0x5a4   : > { %v1570_v19 = vpop.permute.xlu1 %1569 }
 0x5a8   : > { %v1542_v22 = vpop.permute.xlu1 %1541 }
 0x5a9   : > { %v1553_v24 = vsel %vm424_vm0, %v1540_v18, %v1542_v22  ;;  %v1536_v8 = vpop.permute.xlu0 %1535  ;;  %1750 = vmatprep.subr.bf16.mxu1 %v1542_v22 }
 0x5aa   : > { %1751 = vmatpush1.bf16.msra.mxu1 %v1553_v24 }
 0x5ac   : > { %v1548_v45 = vpop.permute.xlu1 %1547 }
 0x5ad   : > { %v1538_v6 = vpop.permute.xlu0 %1537 }
 0x5ae   : > { %v1551_v15 = vsel %vm424_vm0, %v1536_v8, %v1538_v6  ;;  %v1552_v49 = vsel %vm424_vm0, %v1538_v6, %v1540_v18 }
 0x5af   : > { %1697 = vmatprep.subr.bf16.mxu0 %v1552_v49 }
 0x5b0   : > { %1698 = vmatpush1.bf16.msra.mxu0 %v1551_v15  ;;  %v1550_v53 = vpop.permute.xlu1 %1549 }
 0x5b1   : > { %v1556_v44 = vsel %vm424_vm0, %v1548_v45, %v1550_v53  ;;  %v1568_v51 = vpop.permute.xlu0 %1567  ;;  %1752 = vmatprep.subr.bf16.mxu1 %v1550_v53 }
 0x5b2   : > { %1753 = vmatpush1.bf16.msra.mxu1 %v1556_v44  ;;  %v1582_v36 = vsel %vm455_vm1, %v1568_v51, %v1570_v19 }
 0x5b4   : > { %v1572_v29 = vpop.permute.xlu1 %1571 }
 0x5b5   : > { %v1583_v31 = vsel %vm455_vm1, %v1570_v19, %v1572_v29  ;;  %v1544_v32 = vpop.permute.xlu0 %1543  ;;  %1754 = vmatprep.subr.bf16.mxu1 %v1572_v29  ;;  %v1804_v19 = vadd.s32 4294967290, %v3674_v55 }
 0x5b6   : > { %1755 = vmatpush1.bf16.msra.mxu1 %v1583_v31 }
 0x5b7   : > { %vm1808_vm5 = vcmp.ge.s32.totalorder %v1804_v19, 0 }
 0x5b8   : > { %v1578_v34 = vpop.permute.xlu1 %1577 }
 0x5b9   : > { %v1546_v35 = vpop.permute.xlu0 %1545 }
 0x5ba   : > { %v1554_v23 = vsel %vm424_vm0, %v1544_v32, %v1546_v35  ;;  %v1555_v57 = vsel %vm424_vm0, %v1546_v35, %v1548_v45 }
 0x5bb   : > { %1699 = vmatprep.subr.bf16.mxu0 %v1555_v57 }
 0x5bc   : > { %1700 = vmatpush1.bf16.msra.mxu0 %v1554_v23  ;;  %v1580_v60 = vpop.permute.xlu1 %1579 }
 0x5bd   : > { %v1586_v39 = vsel %vm455_vm1, %v1578_v34, %v1580_v60  ;;  %1701 = vmatprep.subr.bf16.mxu0 %v1582_v36  ;;  %v1566_v40 = vpop.permute.xlu0 %1565  ;;  %1756 = vmatprep.subr.bf16.mxu1 %v1580_v60 }
 0x5be   : > { %v1581_v1 = vsel %vm455_vm1, %v1566_v40, %v1568_v51  ;;  %1757 = vmatpush1.bf16.msra.mxu1 %v1586_v39 }
 0x5bf   : > { %1758 = vmatprep.subr.bf16.mxu1 %v3646_v26 }
 0x5c0   : > { %1702 = vmatpush1.bf16.msra.mxu0 %v1581_v1  ;;  %v3042_v12 = vpop.permute.xlu1 %3041 }
 0x5c1   : > { %v1576_v48 = vpop.permute.xlu0 %1575  ;;  %v3043_v46 = vunpack.i.l.bf16 %v3042_v12  ;;  %v3044_v5 = vunpack.i.h.bf16 %v3042_v12 }
 0x5c2   : > { %v1585_v50 = vsel %vm455_vm1, %v1576_v48, %v1578_v34  ;;  %1759 = vmatpush1.bf16.msra.mxu1 %v3646_v26 }
 0x5c3   : > { %1703 = vmatprep.subr.bf16.mxu0 %v1585_v50  ;;  %2095 = vmatprep.subr.bf16.mxu1 %v3817_v28 }
 0x5c4   : > { %v1627_v54 = vpop.permute.xlu1 %1626 }
 0x5c5   : > { %v1574_v27 = vpop.permute.xlu0 %1573  ;;  %2804 = vmatmul.mubr.msk.bf16.vlgmr.msra.gmra.mrb[24].mxu1 %vm484_vm3, %v3066_v13 }
 0x5c6   : > { %v1584_v52 = vsel %vm455_vm1, %v1574_v27, %v1576_v48  ;;  %1788 = vmatprep.mubr.bf16.mxu1 %v3413_v56 }
 0x5c7   : > { %1704 = vmatpush1.bf16.msra.mxu0 %v1584_v52 }
 0x5c8   : > { %1705 = vmatprep.subr.bf16.mxu0 %v3646_v26  ;;  %v1635_v59 = vpop.permute.xlu1 %1634 }
 0x5c9   : > { %v1631_v7 = vpop.permute.xlu0 %1630 }
 0x5ca   : > { %v1661_v42 = vsel %vm1658_vm15, %v1631_v7, %v3043_v46 }
 0x5cb   : > { %1706 = vmatpush1.bf16.msra.mxu0 %v3646_v26 }
 0x5cc   : > { %v4090_v62 = vpop.permute.xlu1 %1646 }
 0x5cd   : > { %2805 = vmatmul.mubr.msk.bf16.gmra.mrb[28].mxu1 %vm484_vm3, %v3067_v30  ;;  %v1639_v58 = vpop.permute.xlu0 %1638 }
 0x5ce   : > { %2802 = vmatmul.mubr.msk.bf16.vlgmr.msra.gmra.mrb[24].mxu0 %vm484_vm3, %v3066_v13  ;;  %2127 = vmatprep.mubr.bf16.mxu1 %v3413_v56  ;;  %v1664_v43 = vsel %vm1658_vm15, %v1639_v58, %v3044_v5 }
 0x5cf   : > { %1735 = vmatprep.mubr.bf16.mxu0 %v3413_v56 }
 0x5d0   : > { %v4093_v41 = vpop.permute.xlu1 %1654 }
 0x5d1   : > { %v1629_v0 = vpop.permute.xlu0 %1628 }
 0x5d2   : > { %v1659_v6 = vsel %vm1658_vm15, %v1627_v54, %v1629_v0  ;;  %v1660_v57 = vsel %vm1658_vm15, %v1629_v0, %v1631_v7 }
 0x5d4   : > { %v1645_v18 = vpop.permute.xlu1 %1644 }
 0x5d5   : > { %v1637_v4 = vpop.permute.xlu0 %1636 }
 0x5d6   : > { %2803 = vmatmul.mubr.msk.bf16.gmra.mrb[28].mxu0 %vm484_vm3, %v3067_v30  ;;  %v1662_v32 = vsel %vm1658_vm15, %v1635_v59, %v1637_v4  ;;  %v1663_v36 = vsel %vm1658_vm15, %v1637_v4, %v1639_v58 }
 0x5d7   : > { %2074 = vmatprep.mubr.bf16.mxu0 %v3413_v56 }
 0x5d8   : > { %v1653_v58 = vpop.permute.xlu1 %1652 }
 0x5d9   : > { %v3047_v37 = vpop.permute.xlu0 %3046 }
 0x5da   : > { %v3048_v20 = vunpack.i.l.bf16 %v3047_v37  ;;  %v3049_v3 = vunpack.i.h.bf16 %v3047_v37  ;;  %v1666_v37 = vsel %vm1658_vm15, %v1645_v18, %v4090_v62 }
 0x5dc   : > { %v1667_v8 = vsel %vm1658_vm15, %v4090_v62, %v3048_v20  ;;  %v1670_v29 = vsel %vm1658_vm15, %v4093_v41, %v3049_v3 }
 0x5dd   : > { %v1643_v22 = vpop.permute.xlu0 %1642 }
 0x5de   : > { %v1665_v4 = vsel %vm1658_vm15, %v1643_v22, %v1645_v18 }
 0x5e1   : > { %v1651_v7 = vpop.permute.xlu0 %1650 }
 0x698   : > { %v1780_v11 = vpop.f32.mrb[24].mxu1 }
 0x699   : > { %v1781_v2 = vadd.f32 %v1780_v11, %v1661_v42  ;;  %v1782_v47 = vpop.f32.mrb[25].mxu1  ;;  %v1668_v42 = vsel %vm1658_vm15, %v1651_v7, %v1653_v58 }
 0x69a   : > { %v1784_v14 = vpop.f32.mrb[26].mxu1  ;;  %v1669_v47 = vsel %vm1658_vm15, %v1653_v58, %v4093_v41  ;;  %v1966_v58 = vpop.permute.xlu1 %1965 }
 0x69b   : > { %v1785_v16 = vadd.f32 %v1784_v14, %v1664_v43  ;;  %v1786_v17 = vpop.f32.mrb[27].mxu1  ;;  %v4098_v21 = vsel %vm1814_vm2, %v1781_v2, 0.0 }
 0x69d   : > { %v4101_v61 = vsel %vm1814_vm2, %v1785_v16, 0.0 }
 0x69e   : > { %v4105_v63 = vpack.c.bf16 %v4101_v61, %v4098_v21 }
 0x6a0   : > { %v2808_v24 = vmul.bf16 3216621497, %v4105_v63  ;;  %v1790_v45 = vpop.f32.mrb[28].mxu1 }
 0x6a1   : > { %v1727_v15 = vpop.f32.mrb[24].mxu0  ;;  %v1791_v49 = vadd.f32 %v1790_v45, %v1667_v8  ;;  %v1792_v53 = vpop.f32.mrb[29].mxu1 }
 0x6a2   : > { %3196 = vpow.bf16 %v2808_v24  ;;  %v1728_v44 = vadd.f32 %v1727_v15, %v1659_v6  ;;  %v1729_v51 = vpop.f32.mrb[25].mxu0  ;;  %v1794_v31 = vpop.f32.mrb[30].mxu1 }
 0x6a3   : > { %v1731_v34 = vpop.f32.mrb[26].mxu0  ;;  %v1795_v35 = vadd.f32 %v1794_v31, %v1670_v29  ;;  %v1796_v23 = vpop.f32.mrb[31].mxu1  ;;  %v4118_v40 = vsel %vm1814_vm2, %v1791_v49, 0.0  ;;  %v4120_v1 = vadd.f32 %v1729_v51, %v1660_v57 }
 0x6a4   : > { %v1732_v60 = vadd.f32 %v1731_v34, %v1662_v32  ;;  %v1733_v39 = vpop.f32.mrb[27].mxu0  ;;  %v4128_v50 = vsel %vm1808_vm5, %v1728_v44, 0.0 }
 0x6a5   : > { %v4123_v48 = vsel %vm1814_vm2, %v1795_v35, 0.0  ;;  %v4125_v13 = vadd.f32 %v1733_v39, %v1663_v36 }
 0x6a6   : > { %v4131_v27 = vsel %vm1808_vm5, %v1732_v60, 0.0  ;;  %v4135_v52 = vpack.c.bf16 %v4123_v48, %v4118_v40 }
 0x6a7   : > { %v4139_v30 = vpack.c.bf16 %v4131_v27, %v4128_v50  ;;  %v4143_v12 = vpack.c.bf16 %v4125_v13, %v4120_v1 }
 0x6a8   : > { %v2812_v54 = vmul.bf16 3216621497, %v4135_v52 }
 0x6a9   : > { %v2806_v59 = vmul.bf16 3216621497, %v4139_v30  ;;  %v2807_v0 = vmul.bf16 3216621497, %v4143_v12  ;;  %v1737_v46 = vpop.f32.mrb[28].mxu0 }
 0x6aa   : > { %3198 = vpow.bf16 %v2812_v54  ;;  %v1738_v5 = vadd.f32 %v1737_v46, %v1665_v4  ;;  %v1739_v10 = vpop.f32.mrb[29].mxu0  ;;  %v1974_v46 = vpop.permute.xlu1 %1973 }
 0x6ab   : > { %3200 = vpow.bf16 %v2806_v59  ;;  %v1741_v11 = vpop.f32.mrb[30].mxu0  ;;  %v4154_v16 = vadd.f32 %v1739_v10, %v1666_v37 }
 0x6ac   : > { %3202 = vpow.bf16 %v2807_v0  ;;  %v1742_v2 = vadd.f32 %v1741_v11, %v1668_v42  ;;  %v1743_v43 = vpop.f32.mrb[31].mxu0  ;;  %v4159_v3 = vsel %vm1808_vm5, %v1738_v5, 0.0 }
 0x6ad   : > { %v3197_v14 = vpop.eup %3196  ;;  %v4156_v17 = vadd.f32 %v1743_v43, %v1669_v47 }
 0x6ae   : > { %v1921_v20 = vadd.bf16 1065369472, %v3197_v14  ;;  %v4162_v22 = vsel %vm1808_vm5, %v1742_v2, 0.0 }
 0x6af   : > { %v1883_v62 = vpack.c.bf16 %v4162_v22, %v4159_v3  ;;  %v1884_v18 = vpack.c.bf16 %v4156_v17, %v4154_v16 }
 0x6b0   : > { %3204 = vrcp.bf16 %v1921_v20 }
 0x6b1   : > { %v2810_v41 = vmul.bf16 3216621497, %v1883_v62  ;;  %v2811_v24 = vmul.bf16 3216621497, %v1884_v18 }
 0x6b3   : > { %3206 = vpow.bf16 %v2810_v41 }
 0x6b4   : > { %3208 = vpow.bf16 %v2811_v24 }
 0x6b5   : > { %v3199_v8 = vpop.eup %3198 }
 0x6b6   : > { %v3201_v45 = vpop.eup %3200  ;;  %v1925_v6 = vadd.bf16 1065369472, %v3199_v8 }
 0x6b7   : > { %v3203_v15 = vpop.eup %3202  ;;  %v1919_v49 = vadd.bf16 1065369472, %v3201_v45  ;;  %v3068_v45 = vld [vmem:[#allocation4 + $0x20] sm:$0xff]  }
 0x6b8   : > { %v1920_v53 = vadd.bf16 1065369472, %v3203_v15  ;;  %3210 = vrcp.bf16 %v1925_v6 }
 0x6b9   : > { %3212 = vrcp.bf16 %v1919_v49 }
 0x6ba   : > { %3214 = vrcp.bf16 %v1920_v53 }
 0x6bb   : > { %v3205_v19 = vpop.eup %3204 }
 0x6bc   : > { %v1932_v44 = vmul.bf16 1065369472, %v3205_v19 }
 0x6be   : > { %v3207_v51 = vpop.eup %3206  ;;  %v1945_v29 = vmul.bf16 %v1932_v44, %v4105_v63  ;;  %v3069_v44 = vld [vmem:[#allocation4 + $0x28] sm:$0xff]  }
 0x6bf   : > { %v3209_v31 = vpop.eup %3208  ;;  %v1923_v32 = vadd.bf16 1065369472, %v3207_v51 }
 0x6c0   : > { %v1924_v34 = vadd.bf16 1065369472, %v3209_v31  ;;  %1963 = vrot.lane.b32.xlu1 %v1945_v29, %s3421_s10  ;;  %2096 = vmatpush1.bf16.msra.mxu1 %v1945_v29 }
 0x6c1   : > { %3216 = vrcp.bf16 %v1923_v32  ;;  %2097 = vmatprep.subr.bf16.mxu1 %v3817_v28 }
 0x6c2   : > { %3218 = vrcp.bf16 %v1924_v34 }
 0x6c3   : > { %v3211_v35 = vpop.eup %3210 }
 0x6c4   : > { %v3213_v23 = vpop.eup %3212  ;;  %1994 = vrot.lane.b32.xlu1 %v1945_v29, %s3422_s27  ;;  %v1940_v57 = vmul.bf16 1065369472, %v3211_v35 }
 0x6c5   : > { %v3215_v60 = vpop.eup %3214  ;;  %v1928_v36 = vmul.bf16 1065369472, %v3213_v23 }
 0x6c6   : > { %v1930_v39 = vmul.bf16 1065369472, %v3215_v60  ;;  %v1949_v63 = vmul.bf16 %v1940_v57, %v4135_v52 }
 0x6c7   : > { %v1943_v7 = vmul.bf16 %v1928_v36, %v4139_v30 }
 0x6c8   : > { %v1944_v54 = vmul.bf16 %v1930_v39, %v4143_v12  ;;  %1971 = vrot.lane.b32.xlu1 %v1949_v63, %s3421_s10  ;;  %2098 = vmatpush1.bf16.msra.mxu1 %v1949_v63 }
 0x6c9   : > { %2099 = vmatprep.subr.bf16.mxu1 %v1966_v58 }
 0x6ca   : > { %1961 = vrot.lane.b32.xlu0 %v1944_v54, %s3421_s10  ;;  %2042 = vmatprep.subr.bf16.mxu0 %v1944_v54 }
 0x6cb   : > { %2043 = vmatpush1.bf16.msra.mxu0 %v1943_v7 }
 0x6cc   : > { %v3217_v59 = vpop.eup %3216  ;;  %1996 = vrot.lane.b32.xlu1 %v3817_v28, %s3422_s27 }
 0x6cd   : > { %v3219_v0 = vpop.eup %3218  ;;  %v1936_v4 = vmul.bf16 1065369472, %v3217_v59 }
 0x6ce   : > { %1959 = vrot.lane.b32.xlu0 %v1943_v7, %s3421_s10  ;;  %v1938_v52 = vmul.bf16 1065369472, %v3219_v0 }
 0x6cf   : > { %v1947_v30 = vmul.bf16 %v1936_v4, %v1883_v62 }
 0x6d0   : > { %v1948_v12 = vmul.bf16 %v1938_v52, %v1884_v18  ;;  %2002 = vrot.lane.b32.xlu1 %v1949_v63, %s3422_s27 }
 0x6d2   : > { %1992 = vrot.lane.b32.xlu0 %v1944_v54, %s3422_s27  ;;  %2044 = vmatprep.subr.bf16.mxu0 %v1948_v12 }
 0x6d3   : > { %2045 = vmatpush1.bf16.msra.mxu0 %v1947_v30 }
 0x6d4   : > { %2004 = vrot.lane.b32.xlu1 %v3817_v28, %s3422_s27 }
 0x6d6   : > { %1990 = vrot.lane.b32.xlu0 %v1943_v7, %s3422_s27 }
 0x6da   : > { %1969 = vrot.lane.b32.xlu0 %v1948_v12, %s3421_s10 }
 0x6de   : > { %1967 = vrot.lane.b32.xlu0 %v1947_v30, %s3421_s10 }
 0x6e2   : > { %2000 = vrot.lane.b32.xlu0 %v1948_v12, %s3422_s27  ;;  %v2227_v12 = vadd.s32 4294967295, %v3688_v9 }
 0x6e4   : > { %vm2235_vm10 = vcmp.lt.s32.totalorder %v2227_v12, 300 }
 0x6e5   : > { %vm2250_vm11 = vmpackc.low %vm3415_vm8, %vm2235_vm10 }
 0x6e6   : > { %1998 = vrot.lane.b32.xlu0 %v1947_v30, %s3422_s27 }
 0x732   : > { %v1964_v5 = vpop.permute.xlu1 %1963 }
 0x733   : > { %v1978_v10 = vsel %vm1975_vm7, %v1964_v5, %v1966_v58 }
 0x734   : > { %2100 = vmatpush1.bf16.msra.mxu1 %v1978_v10 }
 0x735   : > { %2101 = vmatprep.subr.bf16.mxu1 %v1974_v46 }
 0x736   : > { %v1995_v42 = vpop.permute.xlu1 %1994 }
 0x73a   : > { %v1972_v11 = vpop.permute.xlu1 %1971 }
 0x73b   : > { %v1981_v28 = vsel %vm1975_vm7, %v1972_v11, %v1974_v46 }
 0x73c   : > { %v1962_v37 = vpop.permute.xlu0 %1961  ;;  %2102 = vmatpush1.bf16.msra.mxu1 %v1981_v28 }
 0x73d   : > { %v1977_v2 = vsel %vm1975_vm7, %v1962_v37, %v1964_v5 }
 0x73e   : > { %2046 = vmatprep.subr.bf16.mxu0 %v1977_v2  ;;  %v1997_v47 = vpop.permute.xlu1 %1996 }
 0x73f   : > { %v2009_v43 = vsel %vm2006_vm9, %v1995_v42, %v1997_v47  ;;  %2103 = vmatprep.subr.bf16.mxu1 %v1997_v47 }
 0x740   : > { %v1960_v14 = vpop.permute.xlu0 %1959  ;;  %2104 = vmatpush1.bf16.msra.mxu1 %v2009_v43 }
 0x741   : > { %v1976_v20 = vsel %vm1975_vm7, %v1960_v14, %v1962_v37 }
 0x742   : > { %2047 = vmatpush1.bf16.msra.mxu0 %v1976_v20  ;;  %v2003_v62 = vpop.permute.xlu1 %2002 }
 0x744   : > { %v1993_v18 = vpop.permute.xlu0 %1992 }
 0x745   : > { %v2008_v19 = vsel %vm2006_vm9, %v1993_v18, %v1995_v42 }
 0x746   : > { %v2005_v41 = vpop.permute.xlu1 %2004 }
 0x747   : > { %v2012_v24 = vsel %vm2006_vm9, %v2003_v62, %v2005_v41  ;;  %2105 = vmatprep.subr.bf16.mxu1 %v2005_v41 }
 0x748   : > { %v1991_v8 = vpop.permute.xlu0 %1990  ;;  %2106 = vmatpush1.bf16.msra.mxu1 %v2012_v24 }
 0x749   : > { %2107 = vmatprep.subr.bf16.mxu1 %v3646_v26  ;;  %v2007_v29 = vsel %vm2006_vm9, %v1991_v8, %v1993_v18  ;;  %v2252_v8 = vsel %vm2250_vm11, 65537, %v3413_v56 }
 0x74c   : > { %v1970_v6 = vpop.permute.xlu0 %1969  ;;  %2108 = vmatpush1.bf16.msra.mxu1 %v3646_v26 }
 0x74d   : > { %v1980_v15 = vsel %vm1975_vm7, %v1970_v6, %v1972_v11 }
 0x74e   : > { %2048 = vmatprep.subr.bf16.mxu0 %v1980_v15 }
 0x74f   : > { %2818 = vmatmul.mubr.msk.bf16.vlgmr.msra.gmra.mrb[32].mxu1 %vm484_vm3, %v3068_v45 }
 0x750   : > { %v1968_v49 = vpop.permute.xlu0 %1967  ;;  %2137 = vmatprep.mubr.bf16.mxu1 %v3413_v56 }
 0x751   : > { %v1979_v53 = vsel %vm1975_vm7, %v1968_v49, %v1970_v6 }
 0x752   : > { %2049 = vmatpush1.bf16.msra.mxu0 %v1979_v53  ;;  %v2264_v53 = vrot.slane %v2252_v8, %v3695_v25 }
 0x753   : > { %2050 = vmatprep.subr.bf16.mxu0 %v2008_v19 }
 0x754   : > { %v2001_v51 = vpop.permute.xlu0 %2000  ;;  %vm4234_vm8 = vcmp.ne.s16.totalorder %v2264_v53, 0 }
 0x755   : > { %v2011_v31 = vsel %vm2006_vm9, %v2001_v51, %v2003_v62 }
 0x756   : > { %2051 = vmatpush1.bf16.msra.mxu0 %v2007_v29 }
 0x757   : > { %2052 = vmatprep.subr.bf16.mxu0 %v2011_v31  ;;  %2819 = vmatmul.mubr.msk.bf16.gmra.mrb[36].mxu1 %vm484_vm3, %v3069_v44 }
 0x758   : > { %v1999_v32 = vpop.permute.xlu0 %1998 }
 0x759   : > { %v2010_v34 = vsel %vm2006_vm9, %v1999_v32, %v2001_v51 }
 0x75a   : > { %2053 = vmatpush1.bf16.msra.mxu0 %v2010_v34 }
 0x75b   : > { %2054 = vmatprep.subr.bf16.mxu0 %v3646_v26 }
 0x75e   : > { %2055 = vmatpush1.bf16.msra.mxu0 %v3646_v26 }
 0x761   : > { %2816 = vmatmul.mubr.msk.bf16.vlgmr.msra.gmra.mrb[32].mxu0 %vm484_vm3, %v3068_v45 }
 0x762   : > { %2084 = vmatprep.mubr.bf16.mxu0 %v3413_v56 }
 0x769   : > { %2817 = vmatmul.mubr.msk.bf16.gmra.mrb[36].mxu0 %vm484_vm3, %v3069_v44 }
 0x76a   : > { %2490 = vmatprep.mubr.bf16.mxu0 %v3413_v56 }
 0x822   : > { %v2129_v35 = vpop.f32.mrb[32].mxu1 }
 0x823   : > { %v2131_v23 = vpop.f32.mrb[33].mxu1 }
 0x824   : > { %v2133_v57 = vpop.f32.mrb[34].mxu1 }
 0x825   : > { %v2150_v60 = vpack.c.bf16 %v2133_v57, %v2129_v35  ;;  %v2135_v36 = vpop.f32.mrb[35].mxu1  ;;  %v2268_v35 = vrot.slane %v2252_v8, %v3699_v33  ;;  %v2225_v57 = vadd.s32 4294967295, %v3674_v55 }
 0x826   : > { %v2151_v39 = vpack.c.bf16 %v2135_v36, %v2131_v23 }
 0x827   : > { %v2822_v63 = vmul.bf16 3216621497, %v2150_v60  ;;  %vm4246_vm12 = vcmp.ne.s16.totalorder %v2268_v35, 0  ;;  %vm2229_vm13 = vcmp.ge.s32.totalorder %v2225_v57, 0 }
 0x828   : > { %v2823_v7 = vmul.bf16 3216621497, %v2151_v39  ;;  %vm2249_vm14 = vmpackc.low %vm3414_vm6, %vm2229_vm13 }
 0x829   : > { %3220 = vpow.bf16 %v2822_v63 }
 0x82a   : > { %3222 = vpow.bf16 %v2823_v7  ;;  %v2139_v54 = vpop.f32.mrb[36].mxu1 }
 0x82b   : > { %v2141_v58 = vpop.f32.mrb[37].mxu1 }
 0x82c   : > { %v2143_v59 = vpop.f32.mrb[38].mxu1 }
 0x82d   : > { %v4212_v0 = vpack.c.bf16 %v2143_v59, %v2139_v54  ;;  %v2145_v4 = vpop.f32.mrb[39].mxu1 }
 0x82e   : > { %v4214_v52 = vpack.c.bf16 %v2145_v4, %v2141_v58 }
 0x82f   : > { %v2826_v30 = vmul.bf16 3216621497, %v4212_v0 }
 0x830   : > { %v2827_v20 = vmul.bf16 3216621497, %v4214_v52 }
 0x831   : > { %3224 = vpow.bf16 %v2826_v30 }
 0x834   : > { %v3221_v46 = vpop.eup %3220  ;;  %v2076_v5 = vpop.f32.mrb[32].mxu0 }
 0x835   : > { %v3223_v10 = vpop.eup %3222  ;;  %v2190_v42 = vadd.bf16 1065369472, %v3221_v46  ;;  %v2078_v11 = vpop.f32.mrb[33].mxu0 }
 0x836   : > { %v2191_v28 = vadd.bf16 1065369472, %v3223_v10  ;;  %v2080_v37 = vpop.f32.mrb[34].mxu0 }
 0x837   : > { %3226 = vrcp.bf16 %v2190_v42  ;;  %v4218_v2 = vpack.c.bf16 %v2080_v37, %v2076_v5  ;;  %v2082_v47 = vpop.f32.mrb[35].mxu0 }
 0x838   : > { %3228 = vrcp.bf16 %v2191_v28  ;;  %v4220_v43 = vpack.c.bf16 %v2082_v47, %v2078_v11  ;;  %v2251_v28 = vsel %vm2249_vm14, 65537, %v3413_v56 }
 0x839   : > { %v2820_v14 = vmul.bf16 3216621497, %v4218_v2  ;;  %v2256_v47 = vrot.slane %v2251_v28, %v3695_v25 }
 0x83a   : > { %v2821_v9 = vmul.bf16 3216621497, %v4220_v43 }
 0x83b   : > { %3230 = vpow.bf16 %v2820_v14  ;;  %vm4262_vm6 = vcmp.ne.s16.totalorder %v2256_v47, 0 }
 0x83c   : > { %v3225_v62 = vpop.eup %3224  ;;  %3232 = vpow.bf16 %v2821_v9  ;;  %v2086_v18 = vpop.f32.mrb[36].mxu0 }
 0x83d   : > { %v2194_v41 = vadd.bf16 1065369472, %v3225_v62  ;;  %v2088_v24 = vpop.f32.mrb[37].mxu0  ;;  %3234 = vpow.bf16 %v2827_v20 }
 0x83e   : > { %v2090_v45 = vpop.f32.mrb[38].mxu0 }
 0x83f   : > { %3236 = vrcp.bf16 %v2194_v41  ;;  %v4227_v6 = vpack.c.bf16 %v2090_v45, %v2086_v18  ;;  %v2092_v15 = vpop.f32.mrb[39].mxu0 }
 0x840   : > { %v4229_v49 = vpack.c.bf16 %v2092_v15, %v2088_v24 }
 0x841   : > { %v2824_v19 = vmul.bf16 3216621497, %v4227_v6 }
 0x842   : > { %v3227_v44 = vpop.eup %3226  ;;  %v2825_v51 = vmul.bf16 3216621497, %v4229_v49 }
 0x843   : > { %v3229_v29 = vpop.eup %3228  ;;  %v2201_v31 = vmul.bf16 1065369472, %v3227_v44  ;;  %3238 = vpow.bf16 %v2824_v19 }
 0x844   : > { %v2203_v32 = vmul.bf16 1065369472, %v3229_v29  ;;  %3240 = vpow.bf16 %v2825_v51 }
 0x845   : > { %v2214_v23 = vmul.bf16 %v2201_v31, %v2150_v60 }
 0x846   : > { %v3231_v36 = vpop.eup %3230  ;;  %v2215_v7 = vmul.bf16 %v2203_v32, %v2151_v39 }
 0x847   : > { %v3233_v63 = vpop.eup %3232  ;;  %v2188_v54 = vadd.bf16 1065369472, %v3231_v36  ;;  %2895 = vmatprep.subr.msk.bf16.mxu1 %vm4234_vm8, %v2214_v23  ;;  %v2275_v58 = vsel %vm4234_vm8, %v2214_v23, 0 }
 0x848   : > { %v2189_v59 = vadd.bf16 1065369472, %v3233_v63  ;;  %2340 = vrot.lane.b32.xlu0 %v2275_v58, %s3412_s6  ;;  %2312 = vrot.lane.b32.xlu1 %v2275_v58, %s3411_s23  ;;  %v3235_v55 = vpop.eup %3234  ;;  %v2276_v30 = vsel %vm4246_vm12, %v2215_v7, 0 }
 0x849   : > { %3242 = vrcp.bf16 %v2188_v54  ;;  %2878 = vmatpush3.bf16.msra.mxu1 %v2275_v58  ;;  %v2195_v12 = vadd.bf16 1065369472, %v3235_v55 }
 0x84a   : > { %v3237_v60 = vpop.eup %3236  ;;  %3244 = vrcp.bf16 %v2189_v59 }
 0x84b   : > { %v2209_v39 = vmul.bf16 1065369472, %v3237_v60  ;;  %3246 = vrcp.bf16 %v2195_v12 }
 0x84c   : > { %2314 = vrot.lane.b32.xlu0 %v2276_v30, %s3411_s23 }
 0x84d   : > { %v2218_v46 = vmul.bf16 %v2209_v39, %v4212_v0  ;;  %v2260_v0 = vrot.slane %v2251_v28, %v3699_v33 }
 0x84e   : > { %v3239_v5 = vpop.eup %3238 }
 0x84f   : > { %v3241_v10 = vpop.eup %3240  ;;  %v2192_v42 = vadd.bf16 1065369472, %v3239_v5  ;;  %2896 = vmatprep.subr.msk.bf16.mxu1 %vm4234_vm8, %v2218_v46  ;;  %v2279_v11 = vsel %vm4234_vm8, %v2218_v46, 0  ;;  %vm4267_vm15 = vcmp.ne.s16.totalorder %v2260_v0, 0 }
 0x850   : > { %v2193_v37 = vadd.bf16 1065369472, %v3241_v10  ;;  %2880 = vmatpush3.bf16.msra.mxu1 %v2279_v11 }
 0x851   : > { %3248 = vrcp.bf16 %v2192_v42 }
 0x852   : > { %3250 = vrcp.bf16 %v2193_v37 }
 0x854   : > { %v3243_v14 = vpop.eup %3242 }
 0x855   : > { %v3245_v20 = vpop.eup %3244  ;;  %v2197_v9 = vmul.bf16 1065369472, %v3243_v14 }
 0x856   : > { %v2199_v62 = vmul.bf16 1065369472, %v3245_v20  ;;  %v3247_v45 = vpop.eup %3246 }
 0x857   : > { %v2212_v41 = vmul.bf16 %v2197_v9, %v4218_v2  ;;  %v2211_v19 = vmul.bf16 1065369472, %v3247_v45 }
 0x858   : > { %v2213_v8 = vmul.bf16 %v2199_v62, %v4220_v43 }
 0x859   : > { %v2273_v25 = vsel %vm4262_vm6, %v2212_v41, 0  ;;  %v2219_v31 = vmul.bf16 %v2211_v19, %v4214_v52  ;;  %v4298_v52 = vld [vmem:[#allocation7 + $0x20] sm:$0xff]  }
 0x85a   : > { %2866 = vmatprep.subr.msk.bf16.mxu0 %vm4267_vm15, %v2213_v8  ;;  %2308 = vrot.lane.b32.xlu0 %v2273_v25, %s3411_s23  ;;  %v2274_v33 = vsel %vm4267_vm15, %v2213_v8, 0 }
 0x85b   : > { %2459 = vmatpush1.bf16.msra.mxu0 %v2273_v25  ;;  %2338 = vrot.lane.b32.xlu1 %v2274_v33, %s3412_s6 }
 0x85c   : > { %v3249_v2 = vpop.eup %3248  ;;  %2891 = vmatprep.mubr.msk.bf16.mxu1 %vm484_vm3, %v4298_v52 }
 0x85d   : > { %v3251_v15 = vpop.eup %3250  ;;  %v2205_v53 = vmul.bf16 1065369472, %v3249_v2 }
 0x85e   : > { %v2207_v43 = vmul.bf16 1065369472, %v3251_v15  ;;  %2310 = vrot.lane.b32.xlu0 %v2274_v33, %s3411_s23 }
 0x85f   : > { %v2216_v44 = vmul.bf16 %v2205_v53, %v4227_v6  ;;  %v2280_v6 = vsel %vm4246_vm12, %v2219_v31, 0 }
 0x860   : > { %v2217_v51 = vmul.bf16 %v2207_v43, %v4229_v49 }
 0x861   : > { %v2277_v29 = vsel %vm4262_vm6, %v2216_v44, 0 }
 0x862   : > { %2867 = vmatprep.subr.msk.bf16.mxu0 %vm4267_vm15, %v2217_v51  ;;  %2316 = vrot.lane.b32.xlu1 %v2277_v29, %s3411_s23  ;;  %v2278_v32 = vsel %vm4267_vm15, %v2217_v51, 0 }
 0x863   : > { %2320 = vrot.lane.b32.xlu0 %v2279_v11, %s3411_s23  ;;  %2461 = vmatpush1.bf16.msra.mxu0 %v2277_v29 }
 0x866   : > { %2318 = vrot.lane.b32.xlu1 %v2278_v32, %s3411_s23 }
 0x867   : > { %2322 = vrot.lane.b32.xlu0 %v2280_v6, %s3411_s23  ;;  %s3314_s23 = scalar_lea.vmem %s3313_s4, 1536 }
 0x868   : > { %p3316_p2 = scmp.lt.s32.totalorder %s3314_s23, %s3308_s5 }
 0x86a   : > { %2336 = vrot.lane.b32.xlu1 %v2273_v25, %s3412_s6  ;;  %p3317_p3 = por %p3316_p2, %p3315_p11 }
 0x86b   : > { %2348 = vrot.lane.b32.xlu0 %v2279_v11, %s3412_s6 }
 0x86c   : > { %p3318_p5 = pnand %p3317_p3, %p3311_p10 }
 0x86e   : > { %2346 = vrot.lane.b32.xlu1 %v2278_v32, %s3412_s6 }
 0x86f   : > { %2342 = vrot.lane.b32.xlu0 %v2276_v30, %s3412_s6  ;;  %v3071_v30 = vld [vmem:[#allocation7 + $0x28] sm:$0xff]  }
 0x872   : > { %2344 = vrot.lane.b32.xlu1 %v2277_v29, %s3412_s6 }
 0x873   : > { %2395 = vrot.lane.b32.xlu0 %v4128_v50, %s3418_s8 }
 0x876   : > { %2350 = vrot.lane.b32.xlu1 %v2280_v6, %s3412_s6 }
 0x877   : > { %2399 = vrot.lane.b32.xlu0 %v4098_v21, %s3418_s8 }
 0x87a   : > { %2397 = vrot.lane.b32.xlu1 %v4120_v1, %s3418_s8 }
 0x87b   : > { %2403 = vrot.lane.b32.xlu0 %v4131_v27, %s3418_s8 }
 0x87e   : > { %3051 = vrot.lane.b32.xlu1 %v3419_v38, %s3418_s8 }
 0x87f   : > { %2407 = vrot.lane.b32.xlu0 %v4101_v61, %s3418_s8 }
 0x882   : > { %2405 = vrot.lane.b32.xlu1 %v4125_v13, %s3418_s8 }
 0x883   : > { %2413 = vrot.lane.b32.xlu0 %v4154_v16, %s3418_s8 }
 0x886   : > { %2411 = vrot.lane.b32.xlu1 %v4159_v3, %s3418_s8 }
 0x887   : > { %3056 = vrot.lane.b32.xlu0 %v3419_v38, %s3418_s8 }
 0x88a   : > { %2415 = vrot.lane.b32.xlu1 %v4118_v40, %s3418_s8 }
 0x88b   : > { %2421 = vrot.lane.b32.xlu0 %v4156_v17, %s3418_s8 }
 0x88e   : > { %2419 = vrot.lane.b32.xlu1 %v4162_v22, %s3418_s8 }
 0x892   : > { %2423 = vrot.lane.b32.xlu1 %v4123_v48, %s3418_s8 }
 0x8ba   : > { %v2341_v21 = vpop.permute.xlu0 %2340  ;;  %v2313_v61 = vpop.permute.xlu1 %2312 }
 0x8be   : > { %v2315_v1 = vpop.permute.xlu0 %2314 }
 0x8bf   : > { %v2326_v13 = vsel %vm424_vm0, %v2313_v61, %v2315_v1 }
 0x8c0   : > { %2881 = vmatprep.subr.bf16.mxu1 %v2326_v13 }
 0x8c1   : > { %2882 = vmatpush3.bf16.msra.mxu1 %v2326_v13 }
 0x8cc   : > { %v2309_v38 = vpop.permute.xlu0 %2308 }
 0x8cd   : > { %v2339_v50 = vpop.permute.xlu1 %2338 }
 0x8ce   : > { %v2353_v23 = vsel %vm455_vm1, %v2339_v50, %v2341_v21 }
 0x8d0   : > { %v2311_v27 = vpop.permute.xlu0 %2310 }
 0x8d1   : > { %v2324_v40 = vsel %vm424_vm0, %v2309_v38, %v2311_v27  ;;  %v2325_v16 = vsel %vm424_vm0, %v2311_v27, %v2313_v61 }
 0x8d2   : > { %2462 = vmatprep.subr.bf16.mxu0 %v2325_v16 }
 0x8d3   : > { %2463 = vmatpush1.bf16.msra.mxu0 %v2324_v40 }
 0x8d4   : > { %v2317_v17 = vpop.permute.xlu1 %2316 }
 0x8d5   : > { %v2321_v3 = vpop.permute.xlu0 %2320 }
 0x8d8   : > { %v2319_v22 = vpop.permute.xlu1 %2318 }
 0x8d9   : > { %v2327_v48 = vsel %vm424_vm0, %v2317_v17, %v2319_v22  ;;  %v2323_v49 = vpop.permute.xlu0 %2322  ;;  %v2328_v34 = vsel %vm424_vm0, %v2319_v22, %v2321_v3 }
 0x8da   : > { %2464 = vmatprep.subr.bf16.mxu0 %v2328_v34  ;;  %v2329_v35 = vsel %vm424_vm0, %v2321_v3, %v2323_v49 }
 0x8db   : > { %2883 = vmatprep.subr.bf16.mxu1 %v2329_v35  ;;  %2465 = vmatpush1.bf16.msra.mxu0 %v2327_v48 }
 0x8dc   : > { %2884 = vmatpush3.bf16.msra.mxu1 %v2329_v35  ;;  %v2337_v57 = vpop.permute.xlu1 %2336  ;;  %2466 = vmatprep.subr.bf16.mxu0 %v2353_v23 }
 0x8dd   : > { %v2352_v36 = vsel %vm455_vm1, %v2337_v57, %v2339_v50  ;;  %v2349_v63 = vpop.permute.xlu0 %2348 }
 0x8df   : > { %2467 = vmatpush1.bf16.msra.mxu0 %v2352_v36 }
 0x8e0   : > { %v2347_v7 = vpop.permute.xlu1 %2346 }
 0x8e1   : > { %v2343_v54 = vpop.permute.xlu0 %2342  ;;  %v2356_v58 = vsel %vm455_vm1, %v2347_v7, %v2349_v63 }
 0x8e2   : > { %2468 = vmatprep.subr.bf16.mxu0 %v2356_v58  ;;  %v2354_v59 = vsel %vm455_vm1, %v2341_v21, %v2343_v54 }
 0x8e3   : > { %2885 = vmatprep.subr.bf16.mxu1 %v2354_v59 }
 0x8e4   : > { %2886 = vmatpush3.bf16.msra.mxu1 %v2354_v59  ;;  %v2345_v4 = vpop.permute.xlu1 %2344 }
 0x8e5   : > { %v2355_v55 = vsel %vm455_vm1, %v2345_v4, %v2347_v7  ;;  %v2396_v46 = vpop.permute.xlu0 %2395 }
 0x8e6   : > { %2469 = vmatpush1.bf16.msra.mxu0 %v2355_v55 }
 0x8e7   : > { %2470 = vmatprep.subr.bf16.mxu0 %v3646_v26 }
 0x8e8   : > { %v2351_v60 = vpop.permute.xlu1 %2350 }
 0x8e9   : > { %v2357_v39 = vsel %vm455_vm1, %v2349_v63, %v2351_v60  ;;  %v2400_v10 = vpop.permute.xlu0 %2399 }
 0x8ea   : > { %2471 = vmatpush1.bf16.msra.mxu0 %v3646_v26  ;;  %2887 = vmatprep.subr.bf16.mxu1 %v2357_v39 }
 0x8eb   : > { %2888 = vmatpush3.bf16.msra.mxu1 %v2357_v39 }
 0x8ec   : > { %2889 = vmatprep.subr.bf16.mxu1 %v3646_v26  ;;  %v2398_v12 = vpop.permute.xlu1 %2397 }
 0x8ed   : > { %2830 = vmatmul.mubr.msk.bf16.vlgmr.msra.gmra.mrb[40].mxu0 %vm484_vm3, %v4298_v52  ;;  %v2404_v11 = vpop.permute.xlu0 %2403  ;;  %v2429_v18 = vsel %vm1233_vm4, %v2398_v12, %v2400_v10 }
 0x8ee   : > { %2500 = vmatprep.mubr.bf16.mxu0 %v3413_v56  ;;  %v2428_v56 = vsel %vm1233_vm4, %v2396_v46, %v2398_v12 }
 0x8ef   : > { %2890 = vmatpush3.bf16.msra.mxu1 %v3646_v26 }
 0x8f0   : > { %v3052_v5 = vpop.permute.xlu1 %3051 }
 0x8f1   : > { %v2408_v37 = vpop.permute.xlu0 %2407  ;;  %v3053_v24 = vunpack.i.l.bf16 %v3052_v5  ;;  %v3054_v19 = vunpack.i.h.bf16 %v3052_v5 }
 0x8f2   : > { %2892 = vmatmul.mubr.msk.bf16.vlgmr.msra.gmra.mrb[40].mxu1 %vm484_vm3, %v3071_v30 }
 0x8f3   : > { %v2430_v52 = vsel %vm1233_vm4, %v2400_v10, %v3053_v24  ;;  %v2433_v16 = vsel %vm1233_vm4, %v2408_v37, %v3054_v19 }
 0x8f4   : > { %v2406_v42 = vpop.permute.xlu1 %2405 }
 0x8f5   : > { %2831 = vmatmul.mubr.msk.bf16.gmra.mrb[44].mxu0 %vm484_vm3, %v3071_v30  ;;  %v2414_v0 = vpop.permute.xlu0 %2413  ;;  %v2431_v25 = vsel %vm1233_vm4, %v2404_v11, %v2406_v42  ;;  %v2432_v15 = vsel %vm1233_vm4, %v2406_v42, %v2408_v37 }
 0x8f8   : > { %v2412_v28 = vpop.permute.xlu1 %2411 }
 0x8f9   : > { %v3057_v20 = vpop.permute.xlu0 %3056  ;;  %v2434_v27 = vsel %vm1233_vm4, %v2412_v28, %v2414_v0 }
 0x8fa   : > { %v3058_v26 = vunpack.i.l.bf16 %v3057_v20  ;;  %v3059_v45 = vunpack.i.h.bf16 %v3057_v20 }
 0x8fc   : > { %v2416_v47 = vpop.permute.xlu1 %2415 }
 0x8fd   : > { %v2436_v29 = vsel %vm1233_vm4, %v2416_v47, %v3058_v26  ;;  %v2422_v3 = vpop.permute.xlu0 %2421  ;;  %v2435_v34 = vsel %vm1233_vm4, %v2414_v0, %v2416_v47 }
 0x900   : > { %v2420_v14 = vpop.permute.xlu1 %2419 }
 0x901   : > { %v2437_v36 = vsel %vm1233_vm4, %v2420_v14, %v2422_v3 }
 0x904   : > { %v2424_v43 = vpop.permute.xlu1 %2423 }
 0x905   : > { %v2439_v1 = vsel %vm1233_vm4, %v2424_v43, %v3059_v45  ;;  %v2438_v58 = vsel %vm1233_vm4, %v2422_v3, %v2424_v43 }
 0x9c0   : > { %v2492_v9 = vpop.f32.mrb[40].mxu0 }
 0x9c1   : > { %v2493_v62 = vadd.f32 %v2492_v9, %v2428_v56  ;;  %v2494_v41 = vpop.f32.mrb[41].mxu0 }
 0x9c2   : > { %v2495_v8 = vadd.f32 %v2494_v41, %v2429_v18  ;;  %v2496_v33 = vpop.f32.mrb[42].mxu0 }
 0x9c3   : > { %v2497_v2 = vadd.f32 %v2496_v33, %v2431_v25  ;;  %v2498_v53 = vpop.f32.mrb[43].mxu0 }
 0x9c4   : > { %v2850_v44 = vpack.c.bf16 %v2495_v8, %v2493_v62  ;;  %v2499_v51 = vadd.f32 %v2498_v53, %v2432_v15 }
 0x9c5   : > { %v2893_v31 = vpop.f32.mrb[40].mxu1 }
 0x9c6   : > { %2600 = vst [vmem:[%s3579_s21] sm:$0xff] %v2850_v44  ;;  %v2852_v32 = vpack.c.bf16 %v2499_v51, %v2497_v2  ;;  %v2554_v6 = vadd.f32 %v2893_v31, %v2436_v29  ;;  %v2545_v21 = vpop.f32.mrb[41].mxu1 }
 0x9c7   : > { %v2546_v61 = vadd.f32 %v2545_v21, %v2430_v52  ;;  %v2894_v13 = vpop.f32.mrb[42].mxu1 }
 0x9c8   : > { %2602 = vst [vmem:[%s3579_s21 + $0xc] sm:$0xff] %v2852_v32  ;;  %v2855_v38 = vpack.c.bf16 %v2554_v6, %v2554_v6  ;;  %v2557_v50 = vadd.f32 %v2894_v13, %v2439_v1  ;;  %v2502_v40 = vpop.f32.mrb[44].mxu0  ;;  %v2548_v17 = vpop.f32.mrb[43].mxu1 }
 0x9c9   : > { %v2851_v22 = vpack.c.bf16 %v2546_v61, %v2546_v61  ;;  %v2503_v48 = vadd.f32 %v2502_v40, %v2434_v27  ;;  %v2549_v49 = vadd.f32 %v2548_v17, %v2433_v16  ;;  %v2504_v35 = vpop.f32.mrb[45].mxu0 }
 0x9ca   : > { %2605 = vst [vmem:[%s3579_s21 + $0x20] sm:$0xf] %v2855_v38  ;;  %v2857_v23 = vpack.c.bf16 %v2557_v50, %v2557_v50  ;;  %v2505_v57 = vadd.f32 %v2504_v35, %v2435_v34  ;;  %v2506_v63 = vpop.f32.mrb[46].mxu0 }
 0x9cb   : > { %2601 = vst [vmem:[%s3579_s21 + $0x8] sm:$0xf] %v2851_v22  ;;  %v2853_v7 = vpack.c.bf16 %v2549_v49, %v2549_v49  ;;  %v2507_v54 = vadd.f32 %v2506_v63, %v2437_v36  ;;  %v2508_v59 = vpop.f32.mrb[47].mxu0 }
 0x9cc   : > { %2607 = vst [vmem:[%s3579_s21 + $0x2c] sm:$0xf] %v2857_v23  ;;  %v2854_v4 = vpack.c.bf16 %v2505_v57, %v2503_v48  ;;  %v2509_v55 = vadd.f32 %v2508_v59, %v2438_v58 }
 0x9cd   : > { %2603 = vst [vmem:[%s3579_s21 + $0x14] sm:$0xf] %v2853_v7 }
 0x9ce   : > { %2604 = vst [vmem:[%s3579_s21 + $0x18] sm:$0xff] %v2854_v4  ;;  %v2856_v60 = vpack.c.bf16 %v2509_v55, %v2507_v54 }
 0x9d0   : > { %2606 = vst [vmem:[%s3579_s21 + $0x24] sm:$0xff] %v2856_v60 }
 0x9d1   : > { %3321 = shalt.err (!%p3318_p5)
}
 0x9d2   : > { %s3322_s30 = scalar_lea.hbm %s4378_s19, 768  ;;  %s3326_s7 = scalar_lea.hbm %s4435_s3, 1536 }
 0x9d3   : > { %p3323_p6 = scmp.ne.s32.totalorder %s4378_s19, %s3322_s30  ;;  %p3327_p12 = scmp.lt.u32.totalorder %s4378_s19, %s4435_s3 }
 0x9d4   : > { %p3328_p0 = scmp.lt.u32.totalorder %s3326_s7, %s3322_s30  ;;  %p3330_p13 = scmp.lt.u32.totalorder %s3322_s30, %s4378_s19 }
 0x9d5   : > { %p3324_p7 = pnand %p3323_p6, %p4471_p1 }
 0x9d6   : > { %p3329_p4 = por %p3328_p0, %p3327_p12 }
 0x9d7   : > { %p3325_p9 = pneg %p3324_p7 }
 0x9d8   : > { %p3331_p8 = por %p3330_p13, %p3329_p4 }
 0x9da   : > { %p3332_p10 = pnand %p3331_p8, %p3325_p9 }
 0x9dc   : > { %3335 = shalt.err (!%p3332_p10)
}
 0x9dd   : > { %s3424_s10 = smov 192   ;;  %s3425_s27 = smov 12  }
 0x9de   : > { %2907 = dma.vmem_to_hbm [thread:$0]  (%p4471_p1), %s4380_s18, 768, %s4378_s19, %s4386_s28, %s3424_s10, %s3424_s10, %s3425_s27  }
 0x9df PF: > { %p2924_p11 = scmp.ge.s32.totalorder %s3396_s17, 2  ;;  %s2639_s11 = sand.u32 1, %s3376_s12  }
 0x9e0   : > { %p4472_p2 = scmp.ne.s32.totalorder %s4441_s24, 0  ;;  %s2640_s15 = scalar_lea.sflag [#allocation6], %s2639_s11 }
 0x9e2   : > { %p2917_p3 = pnand %p2924_p11, %p4472_p2 }
 0x9e4   : > { %3371 = dma.done.wait (!%p2917_p3), %s2640_s15, 768  }
 0x9e5   : > { %3373 = vsyncadd (!%p2917_p3), %s2640_s15, 4294966528  ;;  %s18_s17 = sadd.s32 1, %s3396_s17   ;;  %s4473_s12 = smov %s3380_s13 }
 0x9e6   : > { %p15_p5 = scmp.ge.s32.totalorder %s18_s17, 4   ;;  %s4474_s13 = smov %s3384_s14 }
 0x9e7   : > { %s4475_s14 = smov %s3499_s25  ;;  %s4476_s15 = smov %s3392_s16 }
 0x9e8   : > { %s4477_s16 = smov %s4479_s20  ;;  %17 = sbr.rel (!%p15_p5) target bundleno = 6 (0x6), region = 144 }
 0x9ef   :  { %2645 = vsyncpa [#allocation5], 1 }
 0x9f0   :  { %2647 = vsyncpa [#allocation5 + $0x1], 1 }
 0x9f1   :  { %2648 = vsyncpa [#allocation8], 1 }
 0x9f2   :  { %2649 = vsyncpa [#allocation6], 1 }
 0x9f3   :  { %2651 = vsyncpa [#allocation6 + $0x1], 1 }
 0x9f4   :  { %2652 = vsyncmov [#allocation3] }
 0x9f7   :  { %s2653_s22 = vpop.sfrf %2652 }
 0x9f8   :  { %p2845_p1 = scmp.ne.s32.totalorder %s2653_s22, 0 }
 0x9fa   :  { %2657 = shalt.err (%p2845_p1)  }
 0x9fb   :  { %2659 = vsyncmov [#allocation3 + $0x1] }
 0x9fe   :  { %s2660_s24 = vpop.sfrf %2659 }
 0x9ff   :  { %p2846_p6 = scmp.ne.s32.totalorder %s2660_s24, 0 }
 0xa01   :  { %2664 = shalt.err (%p2846_p6)  }

</bundles_post_ra>
